<compile_context>
chip_gen: v7x
topology: tpu7x:2x2x1
jax: 0.10.0
libtpu: 0.0.40
codegen_flags: <defaults>
</compile_context>

<pallas_src>
import math

import jax
import jax.numpy as jnp
from jax import lax
from jax.experimental import pallas as pl
from jax.experimental.pallas import tpu as pltpu


def _layernorm(x, gamma, beta, eps=1e-5):
    mu = jnp.mean(x, axis=-1, keepdims=True)
    var = jnp.mean((x - mu) ** 2, axis=-1, keepdims=True)
    return (x - mu) * lax.rsqrt(var + eps) * gamma + beta


# ----------------------------------------------------------------------------
# Fused kernel (single grid step, M = B*S token rows):
#   h     = relu(A @ (X Wg) + bg)                          (GCN, wide matmul)
#   attn  = softmax(q kT) v Wo ; y = LN1(h + attn)         (per-batch scores)
#   ffn   = relu(y W1 + b1) W2 + b2 ; o = LN2(y + ffn)
# ----------------------------------------------------------------------------
def _gnn_trans_kernel(a_ref, xw_ref, wqkv_ref, wo_ref, w1_ref, w2_ref,
                      bh_ref, b1_ref, o_ref, xtok_ref):
    # a_ref    (B, N, N)     f32    adjacency
    # xw_ref   (B, N, T*H)   bf16   node-major X @ Wg (precomputed in wrapper)
    # wqkv_ref (H, 3H)       bf16   fused Q/K/V; q columns pre-scaled 1/sqrt(H)
    # wo_ref   (H, H)        bf16
    # w1_ref   (H, F)        bf16
    # w2_ref   (F, H)        bf16
    # bh_ref   (10, H)       f32    rows: [bg, bq*s, bk, bv, bo, g1, be1, b2, g2, be2]
    # b1_ref   (1, F)        f32
    # o_ref    (M=B*S, H)    f32    token-major (b, t, n) ordering
    # xtok_ref (M, H)        f32    VMEM scratch for the GCN->token re-tiling
    bf16 = jnp.bfloat16
    B, N, TH = xw_ref.shape
    H = wo_ref.shape[0]
    T = TH // H
    S = N * T
    M = B * S

    bias = bh_ref[...]                                      # (10, H) f32
    bg, bq, bk, bv = bias[0:1], bias[1:2], bias[2:3], bias[3:4]
    bo, g1, be1 = bias[4:5], bias[5:6], bias[6:7]
    b2, g2, be2 = bias[7:8], bias[8:9], bias[9:10]

    # ---------------- GCN aggregation: one (N,N)x(N,T*H) pass per batch ------
    h = lax.dot_general(a_ref[...].astype(bf16), xw_ref[...],
                        dimension_numbers=(((2,), (1,)), ((0,), (0,))),
                        preferred_element_type=jnp.float32)     # (B, N, T*H)

    # Re-tile (B, N, T*H) -> (M, H) token rows (order b, t, n) via static
    # 128-lane slices stored into VMEM scratch (cheap copies, no lane-split
    # reshape needed).
    for b in range(B):
        for t in range(T):
            xtok_ref[pl.ds(b * S + t * N, N), :] = h[b, :, t * H:(t + 1) * H]

    x_tok = jnp.maximum(xtok_ref[...] + bg, 0.0)                # (M, H) f32
    x_b = x_tok.astype(bf16)

    # ---------------- Transformer encoder block (all B*S rows at once) -------
    qkv = jnp.dot(x_b, wqkv_ref[...],
                  preferred_element_type=jnp.float32)           # (M, 3H) f32
    # q already carries 1/sqrt(H) (folded into weights/bias at pack time);
    # keep q/k/v only in bf16 so the f32 slices die immediately.
    q = (qkv[:, 0:H] + bq).astype(bf16).reshape(B, S, H)
    k = (qkv[:, H:2 * H] + bk).astype(bf16).reshape(B, S, H)
    v = (qkv[:, 2 * H:3 * H] + bv).astype(bf16).reshape(B, S, H)

    # per-batch scores: contract on H (no k.T materialized)
    s = lax.dot_general(q, k,
                        dimension_numbers=(((2,), (2,)), ((0,), (0,))),
                        preferred_element_type=jnp.float32)     # (B, S, S)
    s = s - jnp.max(s, axis=-1, keepdims=True)
    p = jnp.exp(s)
    p = p * pl.reciprocal(jnp.sum(p, axis=-1, keepdims=True), approx=True)

    attn = lax.dot_general(p.astype(bf16), v,
                           dimension_numbers=(((2,), (1,)), ((0,), (0,))),
                           preferred_element_type=jnp.float32)  # (B, S, H)
    attn = jnp.dot(attn.reshape(M, H).astype(bf16), wo_ref[...],
                   preferred_element_type=jnp.float32) + bo     # (M, H)

    y = _layernorm(x_tok + attn, g1, be1)

    f = jnp.dot(y.astype(bf16), w1_ref[...],
                preferred_element_type=jnp.float32) + b1_ref[...]
    f = jnp.maximum(f, 0.0)
    f = jnp.dot(f.astype(bf16), w2_ref[...],
                preferred_element_type=jnp.float32) + b2

    o_ref[...] = _layernorm(y + f, g2, be2)


# ----------------------------------------------------------------------------
# One-time parameter packing (hoisted out of the forward pass).
# ----------------------------------------------------------------------------
def pack_params(params):
    bf16 = jnp.bfloat16
    H = params["wg"].shape[1]
    scale = 1.0 / math.sqrt(H)
    # fold 1/sqrt(H) into the q columns / bias so the kernel has no scale mul
    wqkv = jnp.concatenate(
        [params["wq"] * scale, params["wk"], params["wv"]], axis=1).astype(bf16)
    bias_stack = jnp.concatenate([
        params["bg"], params["bq"] * scale, params["bk"], params["bv"],
        params["bo"], params["g1"], params["be1"], params["b2"],
        params["g2"], params["be2"],
    ], axis=0).astype(jnp.float32)                              # (10, H)
    return {
        "wg": params["wg"].astype(bf16),
        "wqkv": wqkv,
        "wo": params["wo"].astype(bf16),
        "w1": params["w1"].astype(bf16),
        "w2": params["w2"].astype(bf16),
        "bias": bias_stack,
        "b1": params["b1"].astype(jnp.float32),
    }


# ----------------------------------------------------------------------------
# Wrapper
# ----------------------------------------------------------------------------
def gnn_trans_forward(features, A, packed, pool=False):
    B, T, N, C = features.shape
    H = packed["wg"].shape[1]
    F_ = packed["w1"].shape[1]
    S = T * N
    M = B * S
    bf16 = jnp.bfloat16

    # Input projection X @ Wg done in XLA (C is tiny -> a (·,4) f32 tile would
    # waste lanes / MXU depth in-kernel).  Laid out node-major per batch:
    # xw_nm[b, m, t*H:(t+1)*H] = (X @ Wg)[b, t, m, :]
    xw = jnp.dot(features.reshape(B * T * N, C).astype(bf16), packed["wg"],
                 preferred_element_type=jnp.float32)            # (B*T*N, H)
    xw_nm = (xw.reshape(B, T, N, H).transpose(0, 2, 1, 3)
               .reshape(B, N, T * H).astype(bf16))              # (B, N, T*H)

    out = pl.pallas_call(
        _gnn_trans_kernel,
        out_shape=jax.ShapeDtypeStruct((M, H), jnp.float32),
        grid=(1,),
        in_specs=[
            pl.BlockSpec((B, N, N), lambda i: (0, 0, 0)),       # A
            pl.BlockSpec((B, N, T * H), lambda i: (0, 0, 0)),   # X @ Wg (bf16)
            pl.BlockSpec((H, 3 * H), lambda i: (0, 0)),         # Wqkv
            pl.BlockSpec((H, H), lambda i: (0, 0)),             # Wo
            pl.BlockSpec((H, F_), lambda i: (0, 0)),            # W1
            pl.BlockSpec((F_, H), lambda i: (0, 0)),            # W2
            pl.BlockSpec((10, H), lambda i: (0, 0)),            # bias stack
            pl.BlockSpec((1, F_), lambda i: (0, 0)),            # b1
        ],
        out_specs=pl.BlockSpec((M, H), lambda i: (0, 0)),
        scratch_shapes=[pltpu.VMEM((M, H), jnp.float32)],
        compiler_params=pltpu.CompilerParams(
            dimension_semantics=("arbitrary",)),
    )(A.astype(jnp.float32), xw_nm, packed["wqkv"], packed["wo"],
      packed["w1"], packed["w2"], packed["bias"], packed["b1"])

    out = out.reshape(B, S, H)      # kernel token order (b, t, n) == reference
    if pool:
        out = jnp.mean(out, axis=1)
    return out


# Pure-JAX f32 reference (same semantics) for a loose numerical sanity check.
def _reference_forward(features, A, params, pool=False):
    B, T, N, C = features.shape
    H = params["wg"].shape[1]
    h = jnp.einsum("bij,btjc,ch->btih", A, features, params["wg"]) + params["bg"]
    x = jnp.maximum(h, 0.0).reshape(B, T * N, H)
    scale = 1.0 / math.sqrt(H)
    q = (x @ params["wq"] + params["bq"]) * scale
    k = x @ params["wk"] + params["bk"]
    v = x @ params["wv"] + params["bv"]
    p = jax.nn.softmax(jnp.einsum("bqh,bkh->bqk", q, k), axis=-1)
    attn = jnp.einsum("bqk,bkh->bqh", p, v) @ params["wo"] + params["bo"]

    def ln(z, g, b, eps=1e-5):
        mu = z.mean(-1, keepdims=True)
        var = ((z - mu) ** 2).mean(-1, keepdims=True)
        return (z - mu) / jnp.sqrt(var + eps) * g + b

    y = ln(x + attn, params["g1"], params["be1"])
    f = jnp.maximum(y @ params["w1"] + params["b1"], 0.0) @ params["w2"] + params["b2"]
    out = ln(y + f, params["g2"], params["be2"])
    if pool:
        out = out.mean(axis=1)
    return out


def init_params(key, in_channels, hidden, filter_size):
    ks = jax.random.split(key, 8)
    n01 = lambda k, shp, s: jax.random.normal(k, shp, jnp.float32) * s
    return {
        "wg": n01(ks[0], (in_channels, hidden), 1.0 / math.sqrt(in_channels)),
        "bg": jnp.zeros((1, hidden), jnp.float32),
        "wq": n01(ks[1], (hidden, hidden), 1.0 / math.sqrt(hidden)),
        "bq": jnp.zeros((1, hidden), jnp.float32),
        "wk": n01(ks[2], (hidden, hidden), 1.0 / math.sqrt(hidden)),
        "bk": jnp.zeros((1, hidden), jnp.float32),
        "wv": n01(ks[3], (hidden, hidden), 1.0 / math.sqrt(hidden)),
        "bv": jnp.zeros((1, hidden), jnp.float32),
        "wo": n01(ks[4], (hidden, hidden), 1.0 / math.sqrt(hidden)),
        "bo": jnp.zeros((1, hidden), jnp.float32),
        "g1": jnp.ones((1, hidden), jnp.float32),
        "be1": jnp.zeros((1, hidden), jnp.float32),
        "w1": n01(ks[5], (hidden, filter_size), 1.0 / math.sqrt(hidden)),
        "b1": jnp.zeros((1, filter_size), jnp.float32),
        "w2": n01(ks[6], (filter_size, hidden), 1.0 / math.sqrt(filter_size)),
        "b2": jnp.zeros((1, hidden), jnp.float32),
        "g2": jnp.ones((1, hidden), jnp.float32),
        "be2": jnp.zeros((1, hidden), jnp.float32),
    }


if __name__ == "__main__":
    # batch, time, num_nodes, in_channels; lane-dense hidden/filter (>=128)
    B, T, N, C = 2, 4, 16, 4
    HIDDEN, FILTER = 128, 256

    key = jax.random.PRNGKey(0)
    k_feat, k_adj, k_param = jax.random.split(key, 3)

    features = jax.random.normal(k_feat, (B, T, N, C), jnp.float32)
    # symmetric row-normalized adjacency
    A_raw = jax.random.uniform(k_adj, (B, N, N), jnp.float32)
    A_sym = 0.5 * (A_raw + jnp.swapaxes(A_raw, -1, -2)) + jnp.eye(N)[None]
    A = A_sym / jnp.sum(A_sym, axis=-1, keepdims=True)

    params = init_params(k_param, C, HIDDEN, FILTER)
    packed = pack_params(params)        # one-time packing, outside the forward

    out = gnn_trans_forward(features, A, packed, pool=False)
    out = jax.block_until_ready(out)

    assert out.shape == (B, T * N, HIDDEN)
    assert jnp.all(jnp.isfinite(out))

    # loose check vs f32 reference (kernel uses bf16 matmuls + approx recip)
    ref = _reference_forward(features, A, params, pool=False)
    max_err = float(jnp.max(jnp.abs(out - ref)))
    assert max_err < 0.25, f"max abs error {max_err}"

    print("KERNEL_OK")
</pallas_src>

<mosaic_0001>
module attributes {stable_mosaic.version = 11 : i64} {
  func.func @_gnn_trans_kernel(%arg0: i32, %arg1: memref<2x16x16xf32, #tpu.memory_space<vmem>>, %arg2: memref<2x16x512xbf16, #tpu.memory_space<vmem>>, %arg3: memref<128x384xbf16, #tpu.memory_space<vmem>>, %arg4: memref<128x128xbf16, #tpu.memory_space<vmem>>, %arg5: memref<128x256xbf16, #tpu.memory_space<vmem>>, %arg6: memref<256x128xbf16, #tpu.memory_space<vmem>>, %arg7: memref<10x128xf32, #tpu.memory_space<vmem>>, %arg8: memref<1x256xf32, #tpu.memory_space<vmem>>, %arg9: memref<128x128xf32, #tpu.memory_space<vmem>>, %arg10: memref<128x128xf32, #tpu.memory_space<vmem>>) attributes {dimension_semantics = [#tpu.dimension_semantics<arbitrary>], iteration_bounds = array<i64: 1>, scalar_prefetch = 0 : i64, scratch_operands = 1 : i64, tpu.core_type = #tpu.core_type<tc>, window_params = [{pipeline_mode = #tpu.pipeline_mode<synchronous>, transform_indices = @transform_0, window_bounds = array<i64: 2, 16, 16>}, {pipeline_mode = #tpu.pipeline_mode<synchronous>, transform_indices = @transform_1, window_bounds = array<i64: 2, 16, 512>}, {pipeline_mode = #tpu.pipeline_mode<synchronous>, transform_indices = @transform_2, window_bounds = array<i64: 128, 384>}, {pipeline_mode = #tpu.pipeline_mode<synchronous>, transform_indices = @transform_3, window_bounds = array<i64: 128, 128>}, {pipeline_mode = #tpu.pipeline_mode<synchronous>, transform_indices = @transform_4, window_bounds = array<i64: 128, 256>}, {pipeline_mode = #tpu.pipeline_mode<synchronous>, transform_indices = @transform_5, window_bounds = array<i64: 256, 128>}, {pipeline_mode = #tpu.pipeline_mode<synchronous>, transform_indices = @transform_6, window_bounds = array<i64: 10, 128>}, {pipeline_mode = #tpu.pipeline_mode<synchronous>, transform_indices = @transform_7, window_bounds = array<i64: 1, 256>}, {pipeline_mode = #tpu.pipeline_mode<synchronous>, transform_indices = @transform_8, window_bounds = array<i64: 128, 128>}]} {
    %c0 = arith.constant 0 : index
    %c0_0 = arith.constant 0 : index
    %0 = vector.load %arg7[%c0, %c0_0] : memref<10x128xf32, #tpu.memory_space<vmem>>, vector<10x128xf32>
    %1 = vector.extract_strided_slice %0 {offsets = [0, 0], sizes = [1, 128], strides = [1, 1]} : vector<10x128xf32> to vector<1x128xf32>
    %2 = vector.extract_strided_slice %0 {offsets = [1, 0], sizes = [1, 128], strides = [1, 1]} : vector<10x128xf32> to vector<1x128xf32>
    %3 = vector.extract_strided_slice %0 {offsets = [2, 0], sizes = [1, 128], strides = [1, 1]} : vector<10x128xf32> to vector<1x128xf32>
    %4 = vector.extract_strided_slice %0 {offsets = [3, 0], sizes = [1, 128], strides = [1, 1]} : vector<10x128xf32> to vector<1x128xf32>
    %5 = vector.extract_strided_slice %0 {offsets = [4, 0], sizes = [1, 128], strides = [1, 1]} : vector<10x128xf32> to vector<1x128xf32>
    %6 = vector.extract_strided_slice %0 {offsets = [5, 0], sizes = [1, 128], strides = [1, 1]} : vector<10x128xf32> to vector<1x128xf32>
    %7 = vector.extract_strided_slice %0 {offsets = [6, 0], sizes = [1, 128], strides = [1, 1]} : vector<10x128xf32> to vector<1x128xf32>
    %8 = vector.extract_strided_slice %0 {offsets = [7, 0], sizes = [1, 128], strides = [1, 1]} : vector<10x128xf32> to vector<1x128xf32>
    %9 = vector.extract_strided_slice %0 {offsets = [8, 0], sizes = [1, 128], strides = [1, 1]} : vector<10x128xf32> to vector<1x128xf32>
    %10 = vector.extract_strided_slice %0 {offsets = [9, 0], sizes = [1, 128], strides = [1, 1]} : vector<10x128xf32> to vector<1x128xf32>
    %c0_1 = arith.constant 0 : index
    %c0_2 = arith.constant 0 : index
    %c0_3 = arith.constant 0 : index
    %11 = vector.load %arg1[%c0_1, %c0_2, %c0_3] : memref<2x16x16xf32, #tpu.memory_space<vmem>>, vector<2x16x16xf32>
    %12 = arith.truncf %11 : vector<2x16x16xf32> to vector<2x16x16xbf16>
    %c0_4 = arith.constant 0 : index
    %c0_5 = arith.constant 0 : index
    %c0_6 = arith.constant 0 : index
    %13 = vector.load %arg2[%c0_4, %c0_5, %c0_6] : memref<2x16x512xbf16, #tpu.memory_space<vmem>>, vector<2x16x512xbf16>
    %cst = arith.constant dense<0.000000e+00> : vector<2x16x512xf32>
    %14 = tpu.matmul %12, %13, %cst {dimension_numbers = #tpu.dot_dimension_numbers<[2], [1], [1], [2], [0, 0, 0, 1, 1, 2], [0], [0]>} : vector<2x16x16xbf16>, vector<2x16x512xbf16>, vector<2x16x512xf32> -> vector<2x16x512xf32>
    %15 = vector.extract_strided_slice %14 {offsets = [0, 0, 0], sizes = [1, 16, 128], strides = [1, 1, 1]} : vector<2x16x512xf32> to vector<1x16x128xf32>
    %16 = vector.shape_cast %15 : vector<1x16x128xf32> to vector<16x128xf32>
    %c0_7 = arith.constant 0 : index
    %c0_8 = arith.constant 0 : index
    %17 = vector.load %arg10[%c0_7, %c0_8] : memref<128x128xf32, #tpu.memory_space<vmem>>, vector<16x128xf32>
    tpu.vector_store %arg10[%c0_7, %c0_8], %16 {strides = array<i32>} : memref<128x128xf32, #tpu.memory_space<vmem>>, vector<16x128xf32>,
    %18 = vector.extract_strided_slice %14 {offsets = [0, 0, 128], sizes = [1, 16, 128], strides = [1, 1, 1]} : vector<2x16x512xf32> to vector<1x16x128xf32>
    %19 = vector.shape_cast %18 : vector<1x16x128xf32> to vector<16x128xf32>
    %c16 = arith.constant 16 : index
    %c0_9 = arith.constant 0 : index
    %20 = vector.load %arg10[%c16, %c0_9] : memref<128x128xf32, #tpu.memory_space<vmem>>, vector<16x128xf32>
    tpu.vector_store %arg10[%c16, %c0_9], %19 {strides = array<i32>} : memref<128x128xf32, #tpu.memory_space<vmem>>, vector<16x128xf32>,
    %21 = vector.extract_strided_slice %14 {offsets = [0, 0, 256], sizes = [1, 16, 128], strides = [1, 1, 1]} : vector<2x16x512xf32> to vector<1x16x128xf32>
    %22 = vector.shape_cast %21 : vector<1x16x128xf32> to vector<16x128xf32>
    %c32 = arith.constant 32 : index
    %c0_10 = arith.constant 0 : index
    %23 = vector.load %arg10[%c32, %c0_10] : memref<128x128xf32, #tpu.memory_space<vmem>>, vector<16x128xf32>
    tpu.vector_store %arg10[%c32, %c0_10], %22 {strides = array<i32>} : memref<128x128xf32, #tpu.memory_space<vmem>>, vector<16x128xf32>,
    %24 = vector.extract_strided_slice %14 {offsets = [0, 0, 384], sizes = [1, 16, 128], strides = [1, 1, 1]} : vector<2x16x512xf32> to vector<1x16x128xf32>
    %25 = vector.shape_cast %24 : vector<1x16x128xf32> to vector<16x128xf32>
    %c48 = arith.constant 48 : index
    %c0_11 = arith.constant 0 : index
    %26 = vector.load %arg10[%c48, %c0_11] : memref<128x128xf32, #tpu.memory_space<vmem>>, vector<16x128xf32>
    tpu.vector_store %arg10[%c48, %c0_11], %25 {strides = array<i32>} : memref<128x128xf32, #tpu.memory_space<vmem>>, vector<16x128xf32>,
    %27 = vector.extract_strided_slice %14 {offsets = [1, 0, 0], sizes = [1, 16, 128], strides = [1, 1, 1]} : vector<2x16x512xf32> to vector<1x16x128xf32>
    %28 = vector.shape_cast %27 : vector<1x16x128xf32> to vector<16x128xf32>
    %c64 = arith.constant 64 : index
    %c0_12 = arith.constant 0 : index
    %29 = vector.load %arg10[%c64, %c0_12] : memref<128x128xf32, #tpu.memory_space<vmem>>, vector<16x128xf32>
    tpu.vector_store %arg10[%c64, %c0_12], %28 {strides = array<i32>} : memref<128x128xf32, #tpu.memory_space<vmem>>, vector<16x128xf32>,
    %30 = vector.extract_strided_slice %14 {offsets = [1, 0, 128], sizes = [1, 16, 128], strides = [1, 1, 1]} : vector<2x16x512xf32> to vector<1x16x128xf32>
    %31 = vector.shape_cast %30 : vector<1x16x128xf32> to vector<16x128xf32>
    %c80 = arith.constant 80 : index
    %c0_13 = arith.constant 0 : index
    %32 = vector.load %arg10[%c80, %c0_13] : memref<128x128xf32, #tpu.memory_space<vmem>>, vector<16x128xf32>
    tpu.vector_store %arg10[%c80, %c0_13], %31 {strides = array<i32>} : memref<128x128xf32, #tpu.memory_space<vmem>>, vector<16x128xf32>,
    %33 = vector.extract_strided_slice %14 {offsets = [1, 0, 256], sizes = [1, 16, 128], strides = [1, 1, 1]} : vector<2x16x512xf32> to vector<1x16x128xf32>
    %34 = vector.shape_cast %33 : vector<1x16x128xf32> to vector<16x128xf32>
    %c96 = arith.constant 96 : index
    %c0_14 = arith.constant 0 : index
    %35 = vector.load %arg10[%c96, %c0_14] : memref<128x128xf32, #tpu.memory_space<vmem>>, vector<16x128xf32>
    tpu.vector_store %arg10[%c96, %c0_14], %34 {strides = array<i32>} : memref<128x128xf32, #tpu.memory_space<vmem>>, vector<16x128xf32>,
    %36 = vector.extract_strided_slice %14 {offsets = [1, 0, 384], sizes = [1, 16, 128], strides = [1, 1, 1]} : vector<2x16x512xf32> to vector<1x16x128xf32>
    %37 = vector.shape_cast %36 : vector<1x16x128xf32> to vector<16x128xf32>
    %c112 = arith.constant 112 : index
    %c0_15 = arith.constant 0 : index
    %38 = vector.load %arg10[%c112, %c0_15] : memref<128x128xf32, #tpu.memory_space<vmem>>, vector<16x128xf32>
    tpu.vector_store %arg10[%c112, %c0_15], %37 {strides = array<i32>} : memref<128x128xf32, #tpu.memory_space<vmem>>, vector<16x128xf32>,
    %c0_16 = arith.constant 0 : index
    %c0_17 = arith.constant 0 : index
    %39 = vector.load %arg10[%c0_16, %c0_17] : memref<128x128xf32, #tpu.memory_space<vmem>>, vector<128x128xf32>
    %40 = vector.broadcast %1 : vector<1x128xf32> to vector<128x128xf32>
    %41 = arith.addf %39, %40 : vector<128x128xf32>
    %cst_18 = arith.constant 0.000000e+00 : f32
    %42 = vector.broadcast %cst_18 : f32 to vector<128x128xf32>
    %43 = arith.maximumf %41, %42 : vector<128x128xf32>
    %44 = arith.truncf %43 : vector<128x128xf32> to vector<128x128xbf16>
    %c0_19 = arith.constant 0 : index
    %c0_20 = arith.constant 0 : index
    %45 = vector.load %arg3[%c0_19, %c0_20] : memref<128x384xbf16, #tpu.memory_space<vmem>>, vector<128x384xbf16>
    %cst_21 = arith.constant dense<0.000000e+00> : vector<128x384xf32>
    %46 = tpu.matmul %44, %45, %cst_21 {dimension_numbers = #tpu.dot_dimension_numbers<[1], [0], [0], [1], [0, 0, 1, 1], [], []>} : vector<128x128xbf16>, vector<128x384xbf16>, vector<128x384xf32> -> vector<128x384xf32>
    %47 = vector.extract_strided_slice %46 {offsets = [0, 0], sizes = [128, 128], strides = [1, 1]} : vector<128x384xf32> to vector<128x128xf32>
    %48 = vector.broadcast %2 : vector<1x128xf32> to vector<128x128xf32>
    %49 = arith.addf %47, %48 : vector<128x128xf32>
    %50 = arith.truncf %49 : vector<128x128xf32> to vector<128x128xbf16>
    %51 = vector.shape_cast %50 : vector<128x128xbf16> to vector<2x64x128xbf16>
    %52 = vector.extract_strided_slice %46 {offsets = [0, 128], sizes = [128, 128], strides = [1, 1]} : vector<128x384xf32> to vector<128x128xf32>
    %53 = vector.broadcast %3 : vector<1x128xf32> to vector<128x128xf32>
    %54 = arith.addf %52, %53 : vector<128x128xf32>
    %55 = arith.truncf %54 : vector<128x128xf32> to vector<128x128xbf16>
    %56 = vector.shape_cast %55 : vector<128x128xbf16> to vector<2x64x128xbf16>
    %57 = vector.extract_strided_slice %46 {offsets = [0, 256], sizes = [128, 128], strides = [1, 1]} : vector<128x384xf32> to vector<128x128xf32>
    %58 = vector.broadcast %4 : vector<1x128xf32> to vector<128x128xf32>
    %59 = arith.addf %57, %58 : vector<128x128xf32>
    %60 = arith.truncf %59 : vector<128x128xf32> to vector<128x128xbf16>
    %61 = vector.shape_cast %60 : vector<128x128xbf16> to vector<2x64x128xbf16>
    %cst_22 = arith.constant dense<0.000000e+00> : vector<2x64x64xf32>
    %62 = tpu.matmul %51, %56, %cst_22 {dimension_numbers = #tpu.dot_dimension_numbers<[2], [2], [1], [1], [0, 0, 0, 1, 1, 1], [0], [0]>} : vector<2x64x128xbf16>, vector<2x64x128xbf16>, vector<2x64x64xf32> -> vector<2x64x64xf32>
    %cst_23 = arith.constant dense<0xFF800000> : vector<2x64xf32>
    %63 = vector.multi_reduction <maximumf>, %62, %cst_23 [2] : vector<2x64x64xf32> to vector<2x64xf32>
    %64 = vector.shape_cast %63 : vector<2x64xf32> to vector<2x64x1xf32>
    %65 = vector.broadcast %64 : vector<2x64x1xf32> to vector<2x64x64xf32>
    %66 = arith.subf %62, %65 : vector<2x64x64xf32>
    %67 = math.exp %66 : vector<2x64x64xf32>
    %cst_24 = arith.constant dense<0.000000e+00> : vector<2x64xf32>
    %68 = vector.multi_reduction <add>, %67, %cst_24 [2] : vector<2x64x64xf32> to vector<2x64xf32>
    %69 = vector.shape_cast %68 : vector<2x64xf32> to vector<2x64x1xf32>
    %70 = tpu.reciprocal %69 {approx = true} : vector<2x64x1xf32> -> vector<2x64x1xf32>
    %71 = vector.broadcast %70 : vector<2x64x1xf32> to vector<2x64x64xf32>
    %72 = arith.mulf %67, %71 : vector<2x64x64xf32>
    %73 = arith.truncf %72 : vector<2x64x64xf32> to vector<2x64x64xbf16>
    %cst_25 = arith.constant dense<0.000000e+00> : vector<2x64x128xf32>
    %74 = tpu.matmul %73, %61, %cst_25 {dimension_numbers = #tpu.dot_dimension_numbers<[2], [1], [1], [2], [0, 0, 0, 1, 1, 2], [0], [0]>} : vector<2x64x64xbf16>, vector<2x64x128xbf16>, vector<2x64x128xf32> -> vector<2x64x128xf32>
    %75 = vector.shape_cast %74 : vector<2x64x128xf32> to vector<128x128xf32>
    %76 = arith.truncf %75 : vector<128x128xf32> to vector<128x128xbf16>
    %c0_26 = arith.constant 0 : index
    %c0_27 = arith.constant 0 : index
    %77 = vector.load %arg4[%c0_26, %c0_27] : memref<128x128xbf16, #tpu.memory_space<vmem>>, vector<128x128xbf16>
    %cst_28 = arith.constant dense<0.000000e+00> : vector<128x128xf32>
    %78 = tpu.matmul %76, %77, %cst_28 {dimension_numbers = #tpu.dot_dimension_numbers<[1], [0], [0], [1], [0, 0, 1, 1], [], []>} : vector<128x128xbf16>, vector<128x128xbf16>, vector<128x128xf32> -> vector<128x128xf32>
    %79 = vector.broadcast %5 : vector<1x128xf32> to vector<128x128xf32>
    %80 = arith.addf %78, %79 : vector<128x128xf32>
    %81 = arith.addf %43, %80 : vector<128x128xf32>
    %cst_29 = arith.constant dense<0.000000e+00> : vector<128xf32>
    %82 = vector.multi_reduction <add>, %81, %cst_29 [1] : vector<128x128xf32> to vector<128xf32>
    %83 = vector.shape_cast %82 : vector<128xf32> to vector<128x1xf32>
    %cst_30 = arith.constant 1.280000e+02 : f32
    %84 = vector.broadcast %cst_30 : f32 to vector<128x1xf32>
    %85 = arith.divf %83, %84 : vector<128x1xf32>
    %86 = vector.broadcast %85 : vector<128x1xf32> to vector<128x128xf32>
    %87 = arith.subf %81, %86 : vector<128x128xf32>
    %88 = arith.mulf %87, %87 : vector<128x128xf32>
    %cst_31 = arith.constant dense<0.000000e+00> : vector<128xf32>
    %89 = vector.multi_reduction <add>, %88, %cst_31 [1] : vector<128x128xf32> to vector<128xf32>
    %90 = vector.shape_cast %89 : vector<128xf32> to vector<128x1xf32>
    %cst_32 = arith.constant 1.280000e+02 : f32
    %91 = vector.broadcast %cst_32 : f32 to vector<128x1xf32>
    %92 = arith.divf %90, %91 : vector<128x1xf32>
    %93 = vector.broadcast %85 : vector<128x1xf32> to vector<128x128xf32>
    %94 = arith.subf %81, %93 : vector<128x128xf32>
    %cst_33 = arith.constant 9.99999974E-6 : f32
    %95 = vector.broadcast %cst_33 : f32 to vector<128x1xf32>
    %96 = arith.addf %92, %95 : vector<128x1xf32>
    %97 = math.rsqrt %96 : vector<128x1xf32>
    %98 = vector.broadcast %97 : vector<128x1xf32> to vector<128x128xf32>
    %99 = arith.mulf %94, %98 : vector<128x128xf32>
    %100 = vector.broadcast %6 : vector<1x128xf32> to vector<128x128xf32>
    %101 = arith.mulf %99, %100 : vector<128x128xf32>
    %102 = vector.broadcast %7 : vector<1x128xf32> to vector<128x128xf32>
    %103 = arith.addf %101, %102 : vector<128x128xf32>
    %104 = arith.truncf %103 : vector<128x128xf32> to vector<128x128xbf16>
    %c0_34 = arith.constant 0 : index
    %c0_35 = arith.constant 0 : index
    %105 = vector.load %arg5[%c0_34, %c0_35] : memref<128x256xbf16, #tpu.memory_space<vmem>>, vector<128x256xbf16>
    %cst_36 = arith.constant dense<0.000000e+00> : vector<128x256xf32>
    %106 = tpu.matmul %104, %105, %cst_36 {dimension_numbers = #tpu.dot_dimension_numbers<[1], [0], [0], [1], [0, 0, 1, 1], [], []>} : vector<128x128xbf16>, vector<128x256xbf16>, vector<128x256xf32> -> vector<128x256xf32>
    %c0_37 = arith.constant 0 : index
    %c0_38 = arith.constant 0 : index
    %107 = vector.load %arg8[%c0_37, %c0_38] : memref<1x256xf32, #tpu.memory_space<vmem>>, vector<1x256xf32>
    %108 = vector.broadcast %107 : vector<1x256xf32> to vector<128x256xf32>
    %109 = arith.addf %106, %108 : vector<128x256xf32>
    %cst_39 = arith.constant 0.000000e+00 : f32
    %110 = vector.broadcast %cst_39 : f32 to vector<128x256xf32>
    %111 = arith.maximumf %109, %110 : vector<128x256xf32>
    %112 = arith.truncf %111 : vector<128x256xf32> to vector<128x256xbf16>
    %c0_40 = arith.constant 0 : index
    %c0_41 = arith.constant 0 : index
    %113 = vector.load %arg6[%c0_40, %c0_41] : memref<256x128xbf16, #tpu.memory_space<vmem>>, vector<256x128xbf16>
    %cst_42 = arith.constant dense<0.000000e+00> : vector<128x128xf32>
    %114 = tpu.matmul %112, %113, %cst_42 {dimension_numbers = #tpu.dot_dimension_numbers<[1], [0], [0], [1], [0, 0, 1, 1], [], []>} : vector<128x256xbf16>, vector<256x128xbf16>, vector<128x128xf32> -> vector<128x128xf32>
    %115 = vector.broadcast %8 : vector<1x128xf32> to vector<128x128xf32>
    %116 = arith.addf %114, %115 : vector<128x128xf32>
    %117 = arith.addf %103, %116 : vector<128x128xf32>
    %cst_43 = arith.constant dense<0.000000e+00> : vector<128xf32>
    %118 = vector.multi_reduction <add>, %117, %cst_43 [1] : vector<128x128xf32> to vector<128xf32>
    %119 = vector.shape_cast %118 : vector<128xf32> to vector<128x1xf32>
    %cst_44 = arith.constant 1.280000e+02 : f32
    %120 = vector.broadcast %cst_44 : f32 to vector<128x1xf32>
    %121 = arith.divf %119, %120 : vector<128x1xf32>
    %122 = vector.broadcast %121 : vector<128x1xf32> to vector<128x128xf32>
    %123 = arith.subf %117, %122 : vector<128x128xf32>
    %124 = arith.mulf %123, %123 : vector<128x128xf32>
    %cst_45 = arith.constant dense<0.000000e+00> : vector<128xf32>
    %125 = vector.multi_reduction <add>, %124, %cst_45 [1] : vector<128x128xf32> to vector<128xf32>
    %126 = vector.shape_cast %125 : vector<128xf32> to vector<128x1xf32>
    %cst_46 = arith.constant 1.280000e+02 : f32
    %127 = vector.broadcast %cst_46 : f32 to vector<128x1xf32>
    %128 = arith.divf %126, %127 : vector<128x1xf32>
    %129 = vector.broadcast %121 : vector<128x1xf32> to vector<128x128xf32>
    %130 = arith.subf %117, %129 : vector<128x128xf32>
    %cst_47 = arith.constant 9.99999974E-6 : f32
    %131 = vector.broadcast %cst_47 : f32 to vector<128x1xf32>
    %132 = arith.addf %128, %131 : vector<128x1xf32>
    %133 = math.rsqrt %132 : vector<128x1xf32>
    %134 = vector.broadcast %133 : vector<128x1xf32> to vector<128x128xf32>
    %135 = arith.mulf %130, %134 : vector<128x128xf32>
    %136 = vector.broadcast %9 : vector<1x128xf32> to vector<128x128xf32>
    %137 = arith.mulf %135, %136 : vector<128x128xf32>
    %138 = vector.broadcast %10 : vector<1x128xf32> to vector<128x128xf32>
    %139 = arith.addf %137, %138 : vector<128x128xf32>
    %c0_48 = arith.constant 0 : index
    %c0_49 = arith.constant 0 : index
    %140 = vector.load %arg9[%c0_48, %c0_49] : memref<128x128xf32, #tpu.memory_space<vmem>>, vector<128x128xf32>
    tpu.vector_store %arg9[%c0_48, %c0_49], %139 {strides = array<i32>} : memref<128x128xf32, #tpu.memory_space<vmem>>, vector<128x128xf32>,
    return
  }
  func.func @transform_0(%arg0: i32) -> (i32, i32, i32) {
    %c0_i32 = arith.constant 0 : i32
    %c0_i32_0 = arith.constant 0 : i32
    %c0_i32_1 = arith.constant 0 : i32
    %c0_i32_2 = arith.constant 0 : i32
    return %c0_i32, %c0_i32_0, %c0_i32_1 : i32, i32, i32
  }
  func.func @transform_1(%arg0: i32) -> (i32, i32, i32) {
    %c0_i32 = arith.constant 0 : i32
    %c0_i32_0 = arith.constant 0 : i32
    %c0_i32_1 = arith.constant 0 : i32
    %c0_i32_2 = arith.constant 0 : i32
    return %c0_i32, %c0_i32_0, %c0_i32_1 : i32, i32, i32
  }
  func.func @transform_2(%arg0: i32) -> (i32, i32) {
    %c0_i32 = arith.constant 0 : i32
    %c0_i32_0 = arith.constant 0 : i32
    %c0_i32_1 = arith.constant 0 : i32
    return %c0_i32, %c0_i32_0 : i32, i32
  }
  func.func @transform_3(%arg0: i32) -> (i32, i32) {
    %c0_i32 = arith.constant 0 : i32
    %c0_i32_0 = arith.constant 0 : i32
    %c0_i32_1 = arith.constant 0 : i32
    return %c0_i32, %c0_i32_0 : i32, i32
  }
  func.func @transform_4(%arg0: i32) -> (i32, i32) {
    %c0_i32 = arith.constant 0 : i32
    %c0_i32_0 = arith.constant 0 : i32
    %c0_i32_1 = arith.constant 0 : i32
    return %c0_i32, %c0_i32_0 : i32, i32
  }
  func.func @transform_5(%arg0: i32) -> (i32, i32) {
    %c0_i32 = arith.constant 0 : i32
    %c0_i32_0 = arith.constant 0 : i32
    %c0_i32_1 = arith.constant 0 : i32
    return %c0_i32, %c0_i32_0 : i32, i32
  }
  func.func @transform_6(%arg0: i32) -> (i32, i32) {
    %c0_i32 = arith.constant 0 : i32
    %c0_i32_0 = arith.constant 0 : i32
    %c0_i32_1 = arith.constant 0 : i32
    return %c0_i32, %c0_i32_0 : i32, i32
  }
  func.func @transform_7(%arg0: i32) -> (i32, i32) {
    %c0_i32 = arith.constant 0 : i32
    %c0_i32_0 = arith.constant 0 : i32
    %c0_i32_1 = arith.constant 0 : i32
    return %c0_i32, %c0_i32_0 : i32, i32
  }
  func.func @transform_8(%arg0: i32) -> (i32, i32) {
    %c0_i32 = arith.constant 0 : i32
    %c0_i32_0 = arith.constant 0 : i32
    %c0_i32_1 = arith.constant 0 : i32
    return %c0_i32, %c0_i32_0 : i32, i32
  }
}

</mosaic_0001>

<bundles_post_ra>
// kernel: tpu_custom_call.1
= control target key start
LH: loop header
LB: loop body
LE: loop exit
PB: predicated region body
PF: predicated region fallthrough
CT: control target
= control target key end

     0   :  { %13 = vsyncpa [#allocation4], 0  ;;  %s4391_s0 = inlined_call_operand.hbm [shape: f32[2,16,16], index: 0, kind: input, shape index: {}]   ;;  %s4392_s1 = inlined_call_operand.hbm [shape: bf16[2,16,512], index: 1, kind: input, shape index: {}]   ;;  %s4393_s2 = inlined_call_operand.hbm [shape: bf16[128,384], index: 2, kind: input, shape index: {}]   ;;  %s4394_s3 = inlined_call_operand.hbm [shape: bf16[128,128], index: 3, kind: input, shape index: {}]   ;;  %s4395_s4 = inlined_call_operand.hbm [shape: bf16[128,256], index: 4, kind: input, shape index: {}]   ;;  %s4396_s5 = inlined_call_operand.hbm [shape: bf16[256,128], index: 5, kind: input, shape index: {}]   ;;  %s4397_s6 = inlined_call_operand.vmem [shape: f32[10,128], index: 6, kind: input, shape index: {}]   ;;  %s4398_s7 = inlined_call_operand.vmem [shape: f32[1,256], index: 7, kind: input, shape index: {}]   ;;  %s4399_s8 = inlined_call_operand.hbm [shape: f32[128,128], index: 8, kind: output, shape index: {}]  }
   0x1   :  { %14 = vsyncpa [#allocation7], 0 }
   0x2   :  { %15 = vsyncpa [#allocation10], 0 }
   0x3   :  { %16 = vsyncpa [#allocation13], 0 }
   0x4   :  { %17 = vsyncpa [#allocation5], 0  ;;  %s3285_s27 = smov [#allocation6]   ;;  %s3121_s9 = scalar_lea.hbm %s4392_s1, 1024 }
   0x5   :  { %s35_s28 = sshll.u32 %s3285_s27, 4  ;;  %p3122_p0 = scmp.ne.s32.totalorder %s4392_s1, %s3121_s9  ;;  %s36_s28 = int_to_ptr.vmem [resolvable:$true] %s35_s28 }
   0x6   :  { %p3125_p1 = scmp.lt.u32.totalorder %s3121_s9, %s4392_s1 }
   0x8   :  { %p3127_p2 = pnand %p3125_p1, %p3122_p0 }
   0xa   :  { %3130 = shalt.err (!%p3127_p2)
}
   0xb   :  { %s3131_s14 = scalar_lea.vmem %s36_s28, 1024  ;;  %p3136_p4 = scmp.lt.s32.totalorder %s36_s28, %s36_s28 }
   0xc   :  { %p3132_p3 = scmp.ne.s32.totalorder %s36_s28, %s3131_s14  ;;  %p3137_p5 = scmp.lt.s32.totalorder %s3131_s14, %s3131_s14 }
   0xe   :  { %p3138_p6 = por %p3137_p5, %p3136_p4 }
  0x10   :  { %p3139_p7 = pnand %p3138_p6, %p3132_p3 }
  0x12   :  { %3142 = shalt.err (!%p3139_p7)
}
  0x13   :  { %s3286_s15 = smov 256   ;;  %s3287_s16 = smov 16  }
  0x14   :  { %41 = dma.hbm_to_vmem [thread:$0]  %s4392_s1, 1024, %s36_s28, [#allocation7], %s3286_s15, %s3286_s15, %s3287_s16  }
  0x15   :  { %s3288_s19 = smov [#allocation9]   ;;  %s3143_s23 = scalar_lea.hbm %s4394_s3, 1024 }
  0x16   :  { %s59_s20 = sshll.u32 %s3288_s19, 4  ;;  %p3144_p8 = scmp.ne.s32.totalorder %s4394_s3, %s3143_s23  ;;  %s60_s20 = int_to_ptr.vmem [resolvable:$true] %s59_s20 }
  0x17   :  { %p3147_p9 = scmp.lt.u32.totalorder %s3143_s23, %s4394_s3 }
  0x19   :  { %p3149_p10 = pnand %p3147_p9, %p3144_p8 }
  0x1b   :  { %3152 = shalt.err (!%p3149_p10)
}
  0x1c   :  { %s3153_s29 = scalar_lea.vmem %s60_s20, 1024  ;;  %p3158_p12 = scmp.lt.s32.totalorder %s60_s20, %s60_s20 }
  0x1d   :  { %p3154_p11 = scmp.ne.s32.totalorder %s60_s20, %s3153_s29  ;;  %p3159_p13 = scmp.lt.s32.totalorder %s3153_s29, %s3153_s29 }
  0x1f   :  { %p3160_p0 = por %p3159_p13, %p3158_p12 }
  0x21   :  { %p3161_p1 = pnand %p3160_p0, %p3154_p11 }
  0x23   :  { %3164 = shalt.err (!%p3161_p1)
}
  0x24   :  { %s3289_s1 = smov 64   ;;  %s3290_s28 = smov 4  }
  0x25   :  { %65 = dma.hbm_to_vmem [thread:$0]  %s4394_s3, 1024, %s60_s20, [#allocation10], %s3289_s1, %s3289_s1, %s3290_s28  }
  0x26   :  { %s3291_s10 = smov [#allocation3]   ;;  %s3165_s14 = scalar_lea.hbm %s4391_s0, 512 }
  0x27   :  { %s23_s11 = sshll.u32 %s3291_s10, 4  ;;  %p3166_p2 = scmp.ne.s32.totalorder %s4391_s0, %s3165_s14  ;;  %s24_s11 = int_to_ptr.vmem [resolvable:$true] %s23_s11 }
  0x28   :  { %p3169_p3 = scmp.lt.u32.totalorder %s3165_s14, %s4391_s0 }
  0x2a   :  { %p3171_p4 = pnand %p3169_p3, %p3166_p2 }
  0x2c   :  { %3174 = shalt.err (!%p3171_p4)
}
  0x2d   :  { %s3175_s19 = scalar_lea.vmem %s24_s11, 512  ;;  %p3180_p6 = scmp.lt.s32.totalorder %s24_s11, %s24_s11 }
  0x2e   :  { %p3176_p5 = scmp.ne.s32.totalorder %s24_s11, %s3175_s19  ;;  %p3181_p7 = scmp.lt.s32.totalorder %s3175_s19, %s3175_s19 }
  0x30   :  { %p3182_p8 = por %p3181_p7, %p3180_p6 }
  0x32   :  { %p3183_p9 = pnand %p3182_p8, %p3176_p5 }
  0x34   :  { %3186 = shalt.err (!%p3183_p9)
}
  0x35   :  { %s3292_s3 = smov 128   ;;  %s3293_s20 = smov 8  }
  0x36   :  { %29 = dma.hbm_to_vmem [thread:$0]  %s4391_s0, 512, %s24_s11, [#allocation4], %s3292_s3, %s3292_s3, %s3293_s20  }
  0x37   :  { %s3294_s23 = smov [#allocation8]   ;;  %s3187_s27 = scalar_lea.hbm %s4393_s2, 3072 }
  0x38   :  { %s47_s24 = sshll.u32 %s3294_s23, 4  ;;  %p3188_p10 = scmp.ne.s32.totalorder %s4393_s2, %s3187_s27  ;;  %s48_s24 = int_to_ptr.vmem [resolvable:$true] %s47_s24 }
  0x39   :  { %p3191_p11 = scmp.lt.u32.totalorder %s3187_s27, %s4393_s2 }
  0x3b   :  { %p3193_p12 = pnand %p3191_p11, %p3188_p10 }
  0x3d   :  { %3196 = shalt.err (!%p3193_p12)
}
  0x3e   :  { %s3197_s12 = scalar_lea.vmem %s48_s24, 3072  ;;  %p3202_p0 = scmp.lt.s32.totalorder %s48_s24, %s48_s24 }
  0x3f   :  { %p3198_p13 = scmp.ne.s32.totalorder %s48_s24, %s3197_s12  ;;  %p3203_p1 = scmp.lt.s32.totalorder %s3197_s12, %s3197_s12 }
  0x41   :  { %p3204_p2 = por %p3203_p1, %p3202_p0 }
  0x43   :  { %p3205_p3 = pnand %p3204_p2, %p3198_p13 }
  0x45   :  { %3208 = shalt.err (!%p3205_p3)
}
  0x46   :  { %s3295_s0 = smov 192   ;;  %s3296_s11 = smov 12  }
  0x47   :  { %53 = dma.hbm_to_vmem [thread:$0]  %s4393_s2, 3072, %s48_s24, [#allocation7], %s3295_s0, %s3295_s0, %s3296_s11  }
  0x48   :  { %s3297_s15 = smov [#allocation11]   ;;  %s3298_s17 = smov [#allocation12]  }
  0x49   :  { %s71_s16 = sshll.u32 %s3297_s15, 4  ;;  %s83_s18 = sshll.u32 %s3298_s17, 4  ;;  %s72_s16 = int_to_ptr.vmem [resolvable:$true] %s71_s16  ;;  %s3400_s18 = int_to_ptr.vmem [resolvable:$true] %s83_s18 }
  0x4a   :  { %s3209_s22 = scalar_lea.hbm %s4395_s4, 2048 }
  0x4b   :  { %p3210_p4 = scmp.ne.s32.totalorder %s4395_s4, %s3209_s22  ;;  %p3213_p5 = scmp.lt.u32.totalorder %s3209_s22, %s4395_s4 }
  0x4d   :  { %p3215_p6 = pnand %p3213_p5, %p3210_p4 }
  0x4f   :  { %3218 = shalt.err (!%p3215_p6)
}
  0x50   :  { %s3219_s2 = scalar_lea.vmem %s72_s16, 2048  ;;  %p3224_p8 = scmp.lt.s32.totalorder %s72_s16, %s72_s16 }
  0x51   :  { %p3220_p7 = scmp.ne.s32.totalorder %s72_s16, %s3219_s2  ;;  %p3225_p9 = scmp.lt.s32.totalorder %s3219_s2, %s3219_s2 }
  0x53   :  { %p3226_p10 = por %p3225_p9, %p3224_p8 }
  0x55   :  { %p3227_p11 = pnand %p3226_p10, %p3220_p7 }
  0x57   :  { %3230 = shalt.err (!%p3227_p11)
}
  0x58   :  { %77 = dma.hbm_to_vmem [thread:$0]  %s4395_s4, 2048, %s72_s16, [#allocation10], %s3292_s3, %s3292_s3, %s3293_s20  }
  0x59   :  { %s3231_s10 = scalar_lea.hbm %s4396_s5, 2048 }
  0x5a   :  { %p3232_p12 = scmp.ne.s32.totalorder %s4396_s5, %s3231_s10  ;;  %p3235_p13 = scmp.lt.u32.totalorder %s3231_s10, %s4396_s5 }
  0x5c   :  { %p3237_p0 = pnand %p3235_p13, %p3232_p12 }
  0x5e   :  { %3240 = shalt.err (!%p3237_p0)
}
  0x5f   :  { %s3241_s14 = scalar_lea.vmem %s3400_s18, 2048  ;;  %p3246_p2 = scmp.lt.s32.totalorder %s3400_s18, %s3400_s18 }
  0x60   :  { %p3242_p1 = scmp.ne.s32.totalorder %s3400_s18, %s3241_s14  ;;  %p3247_p3 = scmp.lt.s32.totalorder %s3241_s14, %s3241_s14 }
  0x62   :  { %p3248_p4 = por %p3247_p3, %p3246_p2 }
  0x64   :  { %p3249_p5 = pnand %p3248_p4, %p3242_p1 }
  0x66   :  { %3252 = shalt.err (!%p3249_p5)
}
  0x67   :  { %89 = dma.hbm_to_vmem [thread:$0]  %s4396_s5, 2048, %s3400_s18, [#allocation13], %s3289_s1, %s3289_s1, %s3290_s28  }
  0x68   :  { %3275 = dma.done.wait [#allocation4], 512  }
  0x69   :  { %3276 = vsyncadd [#allocation4], 4294966784 }
  0x6a   :  { %3277 = dma.done.wait [#allocation7], 4096  }
  0x6b   :  { %3278 = vsyncadd [#allocation7], 4294963200 }
  0x6c   :  { %3279 = dma.done.wait [#allocation10], 3072  }
  0x6d   :  { %3280 = vsyncadd [#allocation10], 4294964224 }
  0x6e   :  { %3281 = dma.done.wait [#allocation13], 2048  }
  0x6f   :  { %3282 = vsyncadd [#allocation13], 4294965248  ;;  %v3299_v0 = vmov 0   ;;  %v2899_v1 = vld [vmem:[#allocation6 + $0x4] ss:$16 sps:$4 sm:$0xff]   ;;  %v116_v4 = vld [vmem:[#allocation3 + $0x8] sm:$0xff]  ;;  %v380_v39 = vlaneseq }
  0x70   :  { %185 = vmatprep.mubr.bf16.mxu0 %v3299_v0  ;;  %228 = vmatprep.mubr.bf16.mxu1 %v3299_v0  ;;  %v2901_v2 = vld [vmem:[#allocation6] ss:$16 sps:$4 sm:$0xff]   ;;  %v2902_v6 = vld [vmem:[#allocation6 + $0xc] ss:$16 sps:$4 sm:$0xff]   ;;  %vm149_vm0 = vcmask 130048   ;;  %vm1008_vm1 = vcmask 523264  }
  0x71   :  { %v115_v3 = vld [vmem:[#allocation3] sm:$0xff]  ;;  %153 = vmatprep.subr.bf16.mxu0 %v2899_v1  ;;  %v2904_v7 = vld [vmem:[#allocation6 + $0x8] ss:$16 sps:$4 sm:$0xff]   ;;  %196 = vmatprep.subr.bf16.mxu1 %v2902_v6  ;;  %v117_v10 = vld [vmem:[#allocation3 + $0x10] sm:$0xff]  ;;  %v3446_v40 = vshrl.u32 %v380_v39, 7 }
  0x72   :  { %v119_v5 = vpack.c.bf16 %v116_v4, %v115_v3  ;;  %154 = vmatpush1.bf16.msra.mxu0 %v2901_v2  ;;  %v2905_v8 = vld [vmem:[#allocation6 + $0x20] ss:$16 sps:$4 sm:$0xff]   ;;  %v2907_v9 = vld [vmem:[#allocation6 + $0x24] ss:$16 sps:$4 sm:$0xff]   ;;  %197 = vmatpush1.bf16.msra.mxu1 %v2904_v7  ;;  %v2908_v11 = vld [vmem:[#allocation6 + $0x28] ss:$16 sps:$4 sm:$0xff]  }
  0x73   :  { %262 = vmatprep.subr.bf16.mxu0 %v2907_v9  ;;  %v2910_v12 = vld [vmem:[#allocation6 + $0x2c] ss:$16 sps:$4 sm:$0xff]   ;;  %v2913_v14 = vld [vmem:[#allocation8 + $0x4] ss:$12 sps:$4 sm:$0xff]   ;;  %v2914_v15 = vld [vmem:[#allocation8 + $0x8] ss:$12 sps:$4 sm:$0xff]  }
  0x74   :  { %v118_v13 = vld [vmem:[#allocation3 + $0x18] sm:$0xff]  ;;  %305 = vmatprep.subr.bf16.mxu1 %v2910_v12  ;;  %v2911_v17 = vld [vmem:[#allocation8] ss:$12 sps:$4 sm:$0xff]   ;;  %v2923_v26 = vld [vmem:[#allocation8 + $0x48] ss:$12 sps:$4 sm:$0xff]   ;;  %v3449_v41 = vsub.s32 0, %v3446_v40 }
  0x75   :  { %2531 = vmatmul.mubr.msk.bf16.vlgmr.msra.gmra.mrb[0].mxu0 %vm149_vm0, %v119_v5  ;;  %2532 = vmatmul.mubr.msk.bf16.vlgmr.msra.gmra.mrb[0].mxu1 %vm149_vm0, %v119_v5  ;;  %v120_v16 = vpack.c.bf16 %v118_v13, %v117_v10  ;;  %v2917_v18 = vld [vmem:[#allocation8 + $0x1c] ss:$12 sps:$4 sm:$0xff]   ;;  %v2918_v19 = vld [vmem:[#allocation8 + $0x20] ss:$12 sps:$4 sm:$0xff]   ;;  %v2915_v20 = vld [vmem:[#allocation8 + $0x18] ss:$12 sps:$4 sm:$0xff]  }
  0x76   :  { %263 = vmatpush1.bf16.msra.mxu0 %v2905_v8  ;;  %294 = vmatprep.mubr.bf16.mxu0 %v3299_v0  ;;  %v2921_v21 = vld [vmem:[#allocation8 + $0x34] ss:$12 sps:$4 sm:$0xff]   ;;  %v2922_v22 = vld [vmem:[#allocation8 + $0x38] ss:$12 sps:$4 sm:$0xff]   ;;  %v2919_v23 = vld [vmem:[#allocation8 + $0x30] ss:$12 sps:$4 sm:$0xff]  }
  0x77   :  { %306 = vmatpush1.bf16.msra.mxu1 %v2908_v11  ;;  %337 = vmatprep.mubr.bf16.mxu1 %v3299_v0  ;;  %v2925_v24 = vld [vmem:[#allocation8 + $0x4c] ss:$12 sps:$4 sm:$0xff]   ;;  %v2926_v25 = vld [vmem:[#allocation8 + $0x50] ss:$12 sps:$4 sm:$0xff]   ;;  %v2930_v28 = vld [vmem:[#allocation8 + $0x68] ss:$12 sps:$4 sm:$0xff]  }
  0x78   :  { %584 = vmatprep.subr.bf16.mxu0 %v2913_v14  ;;  %2739 = vmatprep.subr.bf16.mxu1 %v2914_v15  ;;  %v2929_v27 = vld [vmem:[#allocation8 + $0x64] ss:$12 sps:$4 sm:$0xff]   ;;  %v2927_v29 = vld [vmem:[#allocation8 + $0x60] ss:$12 sps:$4 sm:$0xff]   ;;  %v2933_v30 = vld [vmem:[#allocation8 + $0x7c] ss:$12 sps:$4 sm:$0xff]  }
  0x79   :  { %v2934_v31 = vld [vmem:[#allocation8 + $0x80] ss:$12 sps:$4 sm:$0xff]   ;;  %v2931_v32 = vld [vmem:[#allocation8 + $0x78] ss:$12 sps:$4 sm:$0xff]   ;;  %v2935_v34 = vld [vmem:[#allocation8 + $0x90] ss:$12 sps:$4 sm:$0xff]  }
  0x7a   :  { %v2937_v33 = vld [vmem:[#allocation8 + $0x94] ss:$12 sps:$4 sm:$0xff]   ;;  %v2938_v35 = vld [vmem:[#allocation8 + $0x98] ss:$12 sps:$4 sm:$0xff]   ;;  %v2942_v38 = vld [vmem:[#allocation8 + $0xb0] ss:$12 sps:$4 sm:$0xff]  }
  0x7b   :  { %v2941_v36 = vld [vmem:[#allocation8 + $0xac] ss:$12 sps:$4 sm:$0xff]   ;;  %v2939_v37 = vld [vmem:[#allocation8 + $0xa8] ss:$12 sps:$4 sm:$0xff]   ;;  %v3454_v42 = vld [vmem:[%s4397_s6] sm:$0xff]  ;;  %v852_v39 = vsub.s32 3, %v3446_v40 }
  0x7c   :  { %v383_v43 = vrot.slane %v3454_v42, %v3449_v41 }
  0x7d   :  { %2537 = vmatmul.mubr.msk.bf16.vlgmr.msra.gmra.mrb[4].mxu0 %vm149_vm0, %v120_v16  ;;  %2538 = vmatmul.mubr.msk.bf16.vlgmr.msra.gmra.mrb[4].mxu1 %vm149_vm0, %v120_v16 }
  0x7e   :  { %585 = vmatpush1.bf16.msra.mxu0 %v2911_v17  ;;  %616 = vmatprep.mubr.bf16.mxu0 %v3299_v0 }
  0x7f   :  { %586 = vmatprep.subr.bf16.mxu0 %v2917_v18  ;;  %2740 = vmatpush3.bf16.msra.mxu1 %v2914_v15 }
  0x80   :  { %2741 = vmatprep.subr.bf16.mxu1 %v2918_v19 }
  0x82   :  { %587 = vmatpush1.bf16.msra.mxu0 %v2915_v20 }
  0x83   :  { %588 = vmatprep.subr.bf16.mxu0 %v2921_v21  ;;  %2742 = vmatpush3.bf16.msra.mxu1 %v2918_v19 }
  0x84   :  { %2743 = vmatprep.subr.bf16.mxu1 %v2922_v22 }
  0x86   :  { %589 = vmatpush1.bf16.msra.mxu0 %v2919_v23 }
  0x87   :  { %590 = vmatprep.subr.bf16.mxu0 %v2925_v24  ;;  %2744 = vmatpush3.bf16.msra.mxu1 %v2922_v22 }
  0x88   :  { %2745 = vmatprep.subr.bf16.mxu1 %v2926_v25 }
  0x8a   :  { %591 = vmatpush1.bf16.msra.mxu0 %v2923_v26 }
  0x8b   :  { %592 = vmatprep.subr.bf16.mxu0 %v2929_v27  ;;  %2746 = vmatpush3.bf16.msra.mxu1 %v2926_v25 }
  0x8c   :  { %2747 = vmatprep.subr.bf16.mxu1 %v2930_v28 }
  0x8e   :  { %593 = vmatpush1.bf16.msra.mxu0 %v2927_v29 }
  0x8f   :  { %594 = vmatprep.subr.bf16.mxu0 %v2933_v30  ;;  %2748 = vmatpush3.bf16.msra.mxu1 %v2930_v28 }
  0x90   :  { %2749 = vmatprep.subr.bf16.mxu1 %v2934_v31 }
  0x92   :  { %595 = vmatpush1.bf16.msra.mxu0 %v2931_v32 }
  0x93   :  { %2750 = vmatpush3.bf16.msra.mxu1 %v2934_v31  ;;  %596 = vmatprep.subr.bf16.mxu0 %v2937_v33 }
  0x94   :  { %2751 = vmatprep.subr.bf16.mxu1 %v2938_v35 }
  0x96   :  { %597 = vmatpush1.bf16.msra.mxu0 %v2935_v34 }
  0x97   :  { %2752 = vmatpush3.bf16.msra.mxu1 %v2938_v35  ;;  %598 = vmatprep.subr.bf16.mxu0 %v2941_v36 }
  0x98   :  { %2753 = vmatprep.subr.bf16.mxu1 %v2942_v38 }
  0x9a   :  { %599 = vmatpush1.bf16.msra.mxu0 %v2939_v37  ;;  %v3546_v37 = vsub.s32 1, %v3446_v40 }
  0x9b   :  { %2754 = vmatpush3.bf16.msra.mxu1 %v2942_v38  ;;  %v824_v38 = vsub.s32 2, %v3446_v40 }
 0x148   :  { %v187_v44 = vpop.f32.mrb[0].mxu0  ;;  %v230_v49 = vpop.f32.mrb[0].mxu1 }
 0x149   :  { %v3458_v45 = vadd.f32 %v383_v43, %v187_v44  ;;  %v189_v46 = vpop.f32.mrb[1].mxu0  ;;  %v3464_v52 = vadd.f32 %v383_v43, %v230_v49  ;;  %v232_v53 = vpop.f32.mrb[1].mxu1 }
 0x14a   :  { %v3460_v47 = vadd.f32 %v383_v43, %v189_v46  ;;  %v191_v48 = vpop.f32.mrb[2].mxu0  ;;  %v234_v55 = vpop.f32.mrb[2].mxu1  ;;  %v3475_v63 = vadd.f32 %v383_v43, %v232_v53  ;;  %v3555_v46 = vrot.slane %v3454_v42, %v824_v38 }
 0x14b   :  { %v3462_v50 = vadd.f32 %v383_v43, %v191_v48  ;;  %v193_v51 = vpop.f32.mrb[3].mxu0  ;;  %v400_v56 = vmax.f32 %v3458_v45, 0.0  ;;  %v404_v58 = vmax.f32 %v3464_v52, 0.0  ;;  %v3471_v59 = vadd.f32 %v383_v43, %v234_v55  ;;  %v236_v60 = vpop.f32.mrb[3].mxu1 }
 0x14c   :  { %v3466_v54 = vadd.f32 %v383_v43, %v193_v51  ;;  %v402_v61 = vmax.f32 %v3460_v47, 0.0  ;;  %v3477_v1 = vadd.f32 %v383_v43, %v236_v60  ;;  %v406_v9 = vmax.f32 %v3475_v63, 0.0 }
 0x14d   :  { %v401_v57 = vmax.f32 %v3462_v50, 0.0  ;;  %v405_v3 = vmax.f32 %v3471_v59, 0.0  ;;  %v3558_v48 = vrot.slane %v3454_v42, %v852_v39 }
 0x14e   :  { %v403_v62 = vmax.f32 %v3466_v54, 0.0  ;;  %v4408_v10 = vmax.f32 %v3477_v1, 0.0 }
 0x14f   :  { %v416_v2 = vpack.c.bf16 %v401_v57, %v400_v56  ;;  %v418_v6 = vpack.c.bf16 %v405_v3, %v404_v58 }
 0x150   :  { %v417_v4 = vpack.c.bf16 %v403_v62, %v402_v61  ;;  %v296_v5 = vpop.f32.mrb[4].mxu0  ;;  %v339_v12 = vpop.f32.mrb[4].mxu1  ;;  %v419_v20 = vpack.c.bf16 %v4408_v10, %v406_v9 }
 0x151   :  { %617 = vmatmul.mubr.bf16.vlgmr.msra.gmra.mrb[8].mxu0 %v416_v2  ;;  %2755 = vmatprep.mubr.bf16.mxu1 %v416_v2  ;;  %v3492_v7 = vadd.f32 %v383_v43, %v296_v5  ;;  %v298_v8 = vpop.f32.mrb[5].mxu0  ;;  %v341_v16 = vpop.f32.mrb[5].mxu1  ;;  %v3513_v24 = vadd.f32 %v383_v43, %v339_v12 }
 0x152   :  { %2756 = vmatmul.mubr.bf16.vlgmr.msra.gmra.mrb[8].mxu1 %v417_v4  ;;  %626 = vmatprep.mubr.bf16.mxu0 %v3299_v0  ;;  %v300_v11 = vpop.f32.mrb[6].mxu0  ;;  %v343_v17 = vpop.f32.mrb[6].mxu1  ;;  %v3505_v21 = vadd.f32 %v383_v43, %v298_v8  ;;  %v3526_v31 = vadd.f32 %v383_v43, %v341_v16 }
 0x153   :  { %2759 = vmatprep.mubr.bf16.mxu1 %v418_v6  ;;  %v4407_v13 = vmax.f32 %v3492_v7, 0.0  ;;  %v3498_v14 = vadd.f32 %v383_v43, %v300_v11  ;;  %v302_v15 = vpop.f32.mrb[7].mxu0  ;;  %v345_v19 = vpop.f32.mrb[7].mxu1  ;;  %v3515_v25 = vadd.f32 %v383_v43, %v343_v17  ;;  %v4403_v28 = vmax.f32 %v3513_v24, 0.0 }
 0x154   :  { %v3507_v22 = vadd.f32 %v383_v43, %v302_v15  ;;  %v4405_v26 = vmax.f32 %v3505_v21, 0.0  ;;  %v3528_v32 = vadd.f32 %v383_v43, %v345_v19  ;;  %v4401_v34 = vmax.f32 %v3526_v31, 0.0 }
 0x155   :  { %v4406_v18 = vmax.f32 %v3498_v14, 0.0  ;;  %v4402_v29 = vmax.f32 %v3515_v25, 0.0  ;;  %v3552_v43 = vrot.slane %v3454_v42, %v3546_v37 }
 0x156   :  { %v4404_v27 = vmax.f32 %v3507_v22, 0.0  ;;  %v4400_v35 = vmax.f32 %v3528_v32, 0.0 }
 0x157   :  { %v420_v23 = vpack.c.bf16 %v4406_v18, %v4407_v13  ;;  %v422_v33 = vpack.c.bf16 %v4402_v29, %v4403_v28 }
 0x158   :  { %v421_v30 = vpack.c.bf16 %v4404_v27, %v4405_v26  ;;  %v423_v36 = vpack.c.bf16 %v4400_v35, %v4401_v34 }
 0x159   :  { %627 = vmatmul.mubr.bf16.gmra.mrb[12].mxu0 %v417_v4 }
 0x15a   :  { %2760 = vmatmul.mubr.bf16.gmra.mrb[12].mxu1 %v419_v20  ;;  %636 = vmatprep.mubr.bf16.mxu0 %v3299_v0 }
 0x15b   :  { %2763 = vmatprep.mubr.bf16.mxu1 %v420_v23 }
 0x161   :  { %637 = vmatmul.mubr.bf16.gmra.mrb[16].mxu0 %v418_v6 }
 0x162   :  { %646 = vmatprep.mubr.bf16.mxu0 %v3299_v0  ;;  %2764 = vmatmul.mubr.bf16.gmra.mrb[16].mxu1 %v421_v30 }
 0x163   :  { %2767 = vmatprep.mubr.bf16.mxu1 %v422_v33 }
 0x169   :  { %647 = vmatmul.mubr.bf16.gmra.mrb[20].mxu0 %v419_v20 }
 0x16a   :  { %656 = vmatprep.mubr.bf16.mxu0 %v3299_v0  ;;  %2768 = vmatmul.mubr.bf16.gmra.mrb[20].mxu1 %v423_v36 }
 0x171   :  { %657 = vmatmul.mubr.bf16.gmra.mrb[24].mxu0 %v420_v23 }
 0x172   :  { %666 = vmatprep.mubr.bf16.mxu0 %v3299_v0 }
 0x179   :  { %667 = vmatmul.mubr.bf16.gmra.mrb[28].mxu0 %v421_v30 }
 0x17a   :  { %676 = vmatprep.mubr.bf16.mxu0 %v3299_v0 }
 0x181   :  { %677 = vmatmul.mubr.bf16.gmra.mrb[32].mxu0 %v422_v33 }
 0x182   :  { %686 = vmatprep.mubr.bf16.mxu0 %v3299_v0 }
 0x189   :  { %687 = vmatmul.mubr.bf16.gmra.mrb[36].mxu0 %v423_v36 }
 0x224   :  { %v618_v44 = vpop.f32.mrb[8].mxu0 }
 0x225   :  { %v620_v49 = vpop.f32.mrb[9].mxu0  ;;  %v2757_v51 = vpop.f32.mrb[8].mxu1  ;;  %v798_v60 = vadd.f32 %v3552_v43, %v618_v44 }
 0x226   :  { %v622_v53 = vpop.f32.mrb[10].mxu0  ;;  %v731_v55 = vpop.f32.mrb[9].mxu1  ;;  %v826_v6 = vadd.f32 %v3555_v46, %v620_v49  ;;  %v856_v8 = vadd.f32 %v2757_v51, %v3558_v48 }
 0x227   :  { %v799_v2 = vadd.f32 %v3552_v43, %v622_v53  ;;  %v624_v4 = vpop.f32.mrb[11].mxu0  ;;  %v2758_v5 = vpop.f32.mrb[10].mxu1  ;;  %v854_v16 = vadd.f32 %v3558_v48, %v731_v55 }
 0x228   :  { %v827_v11 = vadd.f32 %v3555_v46, %v624_v4  ;;  %v857_v12 = vadd.f32 %v2758_v5, %v3558_v48  ;;  %v734_v42 = vpop.f32.mrb[11].mxu1 }
 0x229   :  { %v814_v15 = vpack.c.bf16 %v799_v2, %v798_v60  ;;  %v855_v17 = vadd.f32 %v3558_v48, %v734_v42 }
 0x22a   :  { %v842_v19 = vpack.c.bf16 %v827_v11, %v826_v6  ;;  %v3568_v20 = vpack.c.bf16 %v857_v12, %v856_v8 }
 0x22b   :  { %v3570_v23 = vpack.c.bf16 %v855_v17, %v854_v16  ;;  %2779 = vmatprep.mubr.bf16.mxu1 %v814_v15 }
 0x22c   :  { %v628_v30 = vpop.f32.mrb[12].mxu0  ;;  %2771 = vmatprep.subr.bf16.mxu1 %v842_v19 }
 0x22d   :  { %v630_v33 = vpop.f32.mrb[13].mxu0  ;;  %2772 = vmatpush3.bf16.xpose.msra.mxu1 %v842_v19  ;;  %v2761_v36 = vpop.f32.mrb[12].mxu1  ;;  %v3574_v49 = vadd.f32 %v3552_v43, %v628_v30 }
 0x22e   :  { %v632_v38 = vpop.f32.mrb[14].mxu0  ;;  %v860_v39 = vadd.f32 %v2761_v36, %v3558_v48  ;;  %v747_v44 = vpop.f32.mrb[13].mxu1  ;;  %v828_v2 = vadd.f32 %v3555_v46, %v630_v33 }
 0x22f   :  { %v3577_v51 = vadd.f32 %v3552_v43, %v632_v38  ;;  %v634_v53 = vpop.f32.mrb[15].mxu0  ;;  %v858_v55 = vadd.f32 %v3558_v48, %v747_v44  ;;  %v2762_v60 = vpop.f32.mrb[14].mxu1 }
 0x230   :  { %v829_v4 = vadd.f32 %v3555_v46, %v634_v53  ;;  %v861_v5 = vadd.f32 %v2762_v60, %v3558_v48  ;;  %v750_v6 = vpop.f32.mrb[15].mxu1 }
 0x231   :  { %v815_v8 = vpack.c.bf16 %v3577_v51, %v3574_v49  ;;  %v859_v11 = vadd.f32 %v3558_v48, %v750_v6 }
 0x232   :  { %v843_v12 = vpack.c.bf16 %v829_v4, %v828_v2  ;;  %v3586_v42 = vpack.c.bf16 %v861_v5, %v860_v39 }
 0x233   :  { %v3588_v15 = vpack.c.bf16 %v859_v11, %v858_v55 }
 0x234   :  { %v638_v16 = vpop.f32.mrb[16].mxu0  ;;  %2773 = vmatprep.subr.bf16.mxu1 %v843_v12 }
 0x235   :  { %v640_v17 = vpop.f32.mrb[17].mxu0  ;;  %2774 = vmatpush3.bf16.xpose.msra.mxu1 %v843_v12  ;;  %v2765_v19 = vpop.f32.mrb[16].mxu1  ;;  %v802_v38 = vadd.f32 %v3552_v43, %v638_v16 }
 0x236   :  { %v642_v30 = vpop.f32.mrb[18].mxu0  ;;  %v864_v33 = vadd.f32 %v2765_v19, %v3558_v48  ;;  %v763_v36 = vpop.f32.mrb[17].mxu1  ;;  %v830_v55 = vadd.f32 %v3555_v46, %v640_v17 }
 0x237   :  { %v803_v44 = vadd.f32 %v3552_v43, %v642_v30  ;;  %v644_v53 = vpop.f32.mrb[19].mxu0  ;;  %v862_v60 = vadd.f32 %v3558_v48, %v763_v36  ;;  %v2766_v39 = vpop.f32.mrb[18].mxu1 }
 0x238   :  { %v831_v2 = vadd.f32 %v3555_v46, %v644_v53  ;;  %v865_v4 = vadd.f32 %v2766_v39, %v3558_v48  ;;  %v766_v5 = vpop.f32.mrb[19].mxu1 }
 0x239   :  { %v816_v6 = vpack.c.bf16 %v803_v44, %v802_v38  ;;  %v863_v11 = vadd.f32 %v3558_v48, %v766_v5 }
 0x23a   :  { %v844_v12 = vpack.c.bf16 %v831_v2, %v830_v55  ;;  %v3598_v19 = vpack.c.bf16 %v865_v4, %v864_v33 }
 0x23b   :  { %v3600_v16 = vpack.c.bf16 %v863_v11, %v862_v60 }
 0x23c   :  { %v648_v30 = vpop.f32.mrb[20].mxu0  ;;  %2775 = vmatprep.subr.bf16.mxu1 %v844_v12 }
 0x23d   :  { %v650_v35 = vpop.f32.mrb[21].mxu0  ;;  %2776 = vmatpush3.bf16.xpose.msra.mxu1 %v844_v12  ;;  %v2769_v36 = vpop.f32.mrb[20].mxu1  ;;  %v804_v39 = vadd.f32 %v3552_v43, %v648_v30 }
 0x23e   :  { %v652_v34 = vpop.f32.mrb[22].mxu0  ;;  %v868_v17 = vadd.f32 %v2769_v36, %v3558_v48  ;;  %v779_v53 = vpop.f32.mrb[21].mxu1  ;;  %v832_v60 = vadd.f32 %v3555_v46, %v650_v35 }
 0x23f   :  { %v805_v38 = vadd.f32 %v3552_v43, %v652_v34  ;;  %v654_v44 = vpop.f32.mrb[23].mxu0  ;;  %v866_v55 = vadd.f32 %v3558_v48, %v779_v53  ;;  %v2770_v33 = vpop.f32.mrb[22].mxu1 }
 0x240   :  { %v833_v2 = vadd.f32 %v3555_v46, %v654_v44  ;;  %v869_v4 = vadd.f32 %v2770_v33, %v3558_v48  ;;  %v782_v5 = vpop.f32.mrb[23].mxu1 }
 0x241   :  { %v817_v11 = vpack.c.bf16 %v805_v38, %v804_v39  ;;  %v867_v12 = vadd.f32 %v3558_v48, %v782_v5 }
 0x242   :  { %v845_v36 = vpack.c.bf16 %v833_v2, %v832_v60  ;;  %v3610_v29 = vpack.c.bf16 %v869_v4, %v868_v17 }
 0x243   :  { %v3612_v30 = vpack.c.bf16 %v867_v12, %v866_v55 }
 0x244   :  { %v658_v34 = vpop.f32.mrb[24].mxu0  ;;  %2777 = vmatprep.subr.bf16.mxu1 %v845_v36 }
 0x245   :  { %v660_v28 = vpop.f32.mrb[25].mxu0  ;;  %2778 = vmatpush3.bf16.xpose.msra.mxu1 %v845_v36  ;;  %v806_v35 = vadd.f32 %v3552_v43, %v658_v34 }
 0x246   :  { %v662_v53 = vpop.f32.mrb[26].mxu0  ;;  %2803 = vmatprep.subr.bf16.mxu1 %v3570_v23  ;;  %v834_v39 = vadd.f32 %v3555_v46, %v660_v28 }
 0x247   :  { %v807_v44 = vadd.f32 %v3552_v43, %v662_v53  ;;  %v664_v33 = vpop.f32.mrb[27].mxu0 }
 0x248   :  { %v835_v48 = vadd.f32 %v3555_v46, %v664_v33 }
 0x249   :  { %v818_v17 = vpack.c.bf16 %v807_v44, %v806_v35 }
 0x24a   :  { %v846_v38 = vpack.c.bf16 %v835_v48, %v834_v39 }
 0x24b   :  { %2795 = vmatprep.mubr.bf16.mxu0 %v818_v17 }
 0x24c   :  { %v668_v55 = vpop.f32.mrb[28].mxu0  ;;  %2780 = vmatmul.mubr.bf16.vlgmr.msra.gmra.mrb[24].mxu1 %v815_v8  ;;  %2787 = vmatprep.subr.bf16.mxu0 %v846_v38 }
 0x24d   :  { %v808_v60 = vadd.f32 %v3552_v43, %v668_v55  ;;  %v670_v2 = vpop.f32.mrb[29].mxu0  ;;  %2783 = vmatprep.mubr.bf16.mxu1 %v816_v6  ;;  %2788 = vmatpush3.bf16.xpose.msra.mxu0 %v846_v38 }
 0x24e   :  { %2804 = vmatpush3.bf16.msra.mxu1 %v3570_v23  ;;  %v672_v4 = vpop.f32.mrb[30].mxu0  ;;  %v836_v12 = vadd.f32 %v3555_v46, %v670_v2 }
 0x24f   :  { %v809_v28 = vadd.f32 %v3552_v43, %v672_v4  ;;  %2805 = vmatprep.subr.bf16.mxu1 %v3568_v20  ;;  %v674_v5 = vpop.f32.mrb[31].mxu0 }
 0x250   :  { %v837_v36 = vadd.f32 %v3555_v46, %v674_v5 }
 0x251   :  { %v819_v49 = vpack.c.bf16 %v809_v28, %v808_v60 }
 0x252   :  { %v847_v51 = vpack.c.bf16 %v837_v36, %v836_v12  ;;  %2806 = vmatpush3.bf16.msra.mxu1 %v3568_v20 }
 0x253   :  { %2807 = vmatprep.subr.bf16.mxu1 %v3588_v15 }
 0x254   :  { %v678_v8 = vpop.f32.mrb[32].mxu0  ;;  %2784 = vmatmul.mubr.bf16.gmra.mrb[28].mxu1 %v817_v11  ;;  %2789 = vmatprep.subr.bf16.mxu0 %v847_v51 }
 0x255   :  { %v810_v23 = vadd.f32 %v3552_v43, %v678_v8  ;;  %v680_v6 = vpop.f32.mrb[33].mxu0  ;;  %2790 = vmatpush3.bf16.xpose.msra.mxu0 %v847_v51 }
 0x256   :  { %2808 = vmatpush3.bf16.msra.mxu1 %v3588_v15  ;;  %v682_v34 = vpop.f32.mrb[34].mxu0  ;;  %v838_v44 = vadd.f32 %v3555_v46, %v680_v6 }
 0x257   :  { %v811_v53 = vadd.f32 %v3552_v43, %v682_v34  ;;  %2809 = vmatprep.subr.bf16.mxu1 %v3586_v42  ;;  %v684_v35 = vpop.f32.mrb[35].mxu0 }
 0x258   :  { %v839_v20 = vadd.f32 %v3555_v46, %v684_v35 }
 0x259   :  { %v820_v33 = vpack.c.bf16 %v811_v53, %v810_v23 }
 0x25a   :  { %v848_v39 = vpack.c.bf16 %v839_v20, %v838_v44  ;;  %2810 = vmatpush3.bf16.msra.mxu1 %v3586_v42 }
 0x25b   :  { %2819 = vmatprep.subr.bf16.mxu1 %v3600_v16 }
 0x25c   :  { %v688_v11 = vpop.f32.mrb[36].mxu0  ;;  %2791 = vmatprep.subr.bf16.mxu0 %v848_v39 }
 0x25d   :  { %v812_v15 = vadd.f32 %v3552_v43, %v688_v11  ;;  %v690_v48 = vpop.f32.mrb[37].mxu0  ;;  %2792 = vmatpush3.bf16.xpose.msra.mxu0 %v848_v39 }
 0x25e   :  { %v692_v17 = vpop.f32.mrb[38].mxu0  ;;  %v840_v60 = vadd.f32 %v3555_v46, %v690_v48 }
 0x25f   :  { %v813_v38 = vadd.f32 %v3552_v43, %v692_v17  ;;  %v694_v55 = vpop.f32.mrb[39].mxu0 }
 0x260   :  { %v841_v2 = vadd.f32 %v3555_v46, %v694_v55 }
 0x261   :  { %v821_v4 = vpack.c.bf16 %v813_v38, %v812_v15 }
 0x262   :  { %v849_v28 = vpack.c.bf16 %v841_v2, %v840_v60 }
 0x264   :  { %2793 = vmatprep.subr.bf16.mxu0 %v849_v28 }
 0x265   :  { %2794 = vmatpush3.bf16.xpose.msra.mxu0 %v849_v28 }
 0x26c   :  { %2796 = vmatmul.mubr.bf16.vlgmr.msra.gmra.mrb[40].mxu0 %v819_v49 }
 0x26d   :  { %2799 = vmatprep.mubr.bf16.mxu0 %v820_v33 }
 0x274   :  { %2800 = vmatmul.mubr.bf16.gmra.mrb[44].mxu0 %v821_v4 }
 0x31f   :  { %v2781_v42 = vpop.f32.mrb[24].mxu1 }
 0x320   :  { %v912_v5 = vpop.f32.mrb[25].mxu1  ;;  %v1015_v12 = vsel %vm1008_vm1, %v2781_v42, -inf }
 0x321   :  { %1016 = vmax.xlane.f32.xlu1 %v1015_v12  ;;  %v2782_v36 = vpop.f32.mrb[26].mxu1  ;;  %v1009_v43 = vsel %vm1008_vm1, %v912_v5, -inf }
 0x322   :  { %1010 = vmax.xlane.f32.xlu0 %v1009_v43  ;;  %v915_v51 = vpop.f32.mrb[27].mxu1  ;;  %v1018_v46 = vsel %vm1008_vm1, %v2782_v36, -inf }
 0x323   :  { %v1012_v8 = vsel %vm1008_vm1, %v915_v51, -inf }
 0x325   :  { %1019 = vmax.xlane.f32.xlu1 %v1018_v46 }
 0x326   :  { %1013 = vmax.xlane.f32.xlu0 %v1012_v8 }
 0x327   :  { %v3646_v49 = vpop.f32.mrb[28].mxu1 }
 0x328   :  { %v928_v23 = vpop.f32.mrb[29].mxu1  ;;  %v1027_v44 = vsel %vm1008_vm1, %v3646_v49, -inf }
 0x329   :  { %v3648_v6 = vpop.f32.mrb[30].mxu1  ;;  %v1021_v34 = vsel %vm1008_vm1, %v928_v23, -inf }
 0x32a   :  { %1022 = vmax.xlane.f32.xlu0 %v1021_v34  ;;  %v931_v53 = vpop.f32.mrb[31].mxu1  ;;  %v1030_v20 = vsel %vm1008_vm1, %v3648_v6, -inf }
 0x32b   :  { %v1024_v35 = vsel %vm1008_vm1, %v931_v53, -inf }
 0x32c   :  { %1025 = vmax.xlane.f32.xlu1 %v1024_v35 }
 0x32e   :  { %1028 = vmax.xlane.f32.xlu0 %v1027_v44 }
 0x330   :  { %1031 = vmax.xlane.f32.xlu1 %v1030_v20 }
 0x33f   :  { %v3656_v33 = vpop.f32.mrb[40].mxu0 }
 0x340   :  { %v3658_v39 = vpop.f32.mrb[41].mxu0  ;;  %v1039_v38 = vsel %vm1008_vm1, %v3656_v33, -inf }
 0x341   :  { %v3660_v11 = vpop.f32.mrb[42].mxu0  ;;  %v1033_v15 = vsel %vm1008_vm1, %v3658_v39, -inf }
 0x342   :  { %1034 = vmax.xlane.f32.xlu0 %v1033_v15  ;;  %v3664_v48 = vpop.f32.mrb[43].mxu0  ;;  %v1042_v60 = vsel %vm1008_vm1, %v3660_v11, -inf }
 0x343   :  { %v1036_v17 = vsel %vm1008_vm1, %v3664_v48, -inf }
 0x344   :  { %1037 = vmax.xlane.f32.xlu1 %v1036_v17 }
 0x346   :  { %1040 = vmax.xlane.f32.xlu0 %v1039_v38 }
 0x347   :  { %v3670_v55 = vpop.f32.mrb[44].mxu0 }
 0x348   :  { %1043 = vmax.xlane.f32.xlu1 %v1042_v60  ;;  %v3674_v2 = vpop.f32.mrb[45].mxu0  ;;  %v1051_v46 = vsel %vm1008_vm1, %v3670_v55, -inf }
 0x349   :  { %v3676_v4 = vpop.f32.mrb[46].mxu0  ;;  %v1045_v28 = vsel %vm1008_vm1, %v3674_v2, -inf }
 0x34a   :  { %1046 = vmax.xlane.f32.xlu0 %v1045_v28  ;;  %v3680_v12 = vpop.f32.mrb[47].mxu0  ;;  %v1054_v8 = vsel %vm1008_vm1, %v3676_v4, -inf }
 0x34b   :  { %v1048_v43 = vsel %vm1008_vm1, %v3680_v12, -inf }
 0x34c   :  { %1049 = vmax.xlane.f32.xlu1 %v1048_v43 }
 0x34e   :  { %1052 = vmax.xlane.f32.xlu0 %v1051_v46 }
 0x350   :  { %1055 = vmax.xlane.f32.xlu1 %v1054_v8 }
 0x3ae   :  { %v1017_v34 = vpop.xlane.xlu1 %1016 }
 0x3af   :  { %v1059_v35 = vsub.f32 %v2781_v42, %v1017_v34  ;;  %v1011_v44 = vpop.xlane.xlu0 %1010 }
 0x3b0   :  { %v1057_v20 = vsub.f32 %v912_v5, %v1011_v44 }
 0x3b1   :  { %v1077_v15 = vmul.f32 1.442695, %v1059_v35 }
 0x3b2   :  { %v1073_v17 = vmul.f32 1.442695, %v1057_v20  ;;  %v1020_v38 = vpop.xlane.xlu1 %1019 }
 0x3b3   :  { %v1060_v60 = vsub.f32 %v2782_v36, %v1020_v38  ;;  %v1014_v28 = vpop.xlane.xlu0 %1013 }
 0x3b4   :  { %2991 = vpow2.f32 %v1073_v17  ;;  %v1058_v27 = vsub.f32 %v915_v51, %v1014_v28 }
 0x3b5   :  { %2993 = vpow2.f32 %v1077_v15  ;;  %v1079_v43 = vmul.f32 1.442695, %v1060_v60 }
 0x3b6   :  { %v1075_v26 = vmul.f32 1.442695, %v1058_v27 }
 0x3b7   :  { %v1023_v18 = vpop.xlane.xlu0 %1022 }
 0x3b8   :  { %2995 = vpow2.f32 %v1075_v26  ;;  %v1061_v46 = vsub.f32 %v928_v23, %v1023_v18 }
 0x3b9   :  { %v1026_v13 = vpop.xlane.xlu1 %1025  ;;  %2997 = vpow2.f32 %v1079_v43 }
 0x3ba   :  { %v1081_v8 = vmul.f32 1.442695, %v1061_v46  ;;  %v1062_v10 = vsub.f32 %v931_v53, %v1026_v13 }
 0x3bb   :  { %v1029_v42 = vpop.xlane.xlu0 %1028 }
 0x3bc   :  { %2999 = vpow2.f32 %v1081_v8  ;;  %v1083_v5 = vmul.f32 1.442695, %v1062_v10  ;;  %v1063_v34 = vsub.f32 %v3646_v49, %v1029_v42 }
 0x3bd   :  { %v1032_v35 = vpop.xlane.xlu1 %1031 }
 0x3be   :  { %v3689_v36 = vpop.eup %2991  ;;  %3001 = vpow2.f32 %v1083_v5  ;;  %v1085_v51 = vmul.f32 1.442695, %v1063_v34  ;;  %v1064_v44 = vsub.f32 %v3648_v6, %v1032_v35 }
 0x3bf   :  { %v1105_v26 = vsel %vm1008_vm1, %v3689_v36, 0.0  ;;  %v3694_v18 = vpop.eup %2993 }
 0x3c0   :  { %3003 = vpow2.f32 %v1085_v51  ;;  %v1087_v27 = vmul.f32 1.442695, %v1064_v44  ;;  %1106 = vadd.xlane.f32.xlu0 %v1105_v26  ;;  %v1111_v10 = vsel %vm1008_vm1, %v3694_v18, 0.0 }
 0x3c2   :  { %v3696_v13 = vpop.eup %2995  ;;  %3005 = vpow2.f32 %v1087_v27 }
 0x3c3   :  { %v1108_v49 = vsel %vm1008_vm1, %v3696_v13, 0.0  ;;  %v3702_v23 = vpop.eup %2997 }
 0x3c4   :  { %1112 = vadd.xlane.f32.xlu0 %v1111_v10  ;;  %1109 = vadd.xlane.f32.xlu1 %v1108_v49  ;;  %v1114_v20 = vsel %vm1008_vm1, %v3702_v23, 0.0 }
 0x3c6   :  { %v3704_v6 = vpop.eup %2999 }
 0x3c7   :  { %v1117_v53 = vsel %vm1008_vm1, %v3704_v6, 0.0 }
 0x3c8   :  { %v3710_v15 = vpop.eup %3001  ;;  %1118 = vadd.xlane.f32.xlu0 %v1117_v53  ;;  %1115 = vadd.xlane.f32.xlu1 %v1114_v20 }
 0x3c9   :  { %v1120_v60 = vsel %vm1008_vm1, %v3710_v15, 0.0 }
 0x3ca   :  { %v3712_v17 = vpop.eup %3003 }
 0x3cb   :  { %v1123_v38 = vsel %vm1008_vm1, %v3712_v17, 0.0 }
 0x3cc   :  { %v3718_v28 = vpop.eup %3005  ;;  %1124 = vadd.xlane.f32.xlu0 %v1123_v38  ;;  %1121 = vadd.xlane.f32.xlu1 %v1120_v60 }
 0x3cd   :  { %v1126_v46 = vsel %vm1008_vm1, %v3718_v28, 0.0 }
 0x3cf   :  { %v1035_v43 = vpop.xlane.xlu0 %1034 }
 0x3d0   :  { %v1065_v8 = vsub.f32 %v3658_v39, %v1035_v43  ;;  %1127 = vadd.xlane.f32.xlu1 %v1126_v46 }
 0x3d1   :  { %v1038_v42 = vpop.xlane.xlu1 %1037 }
 0x3d2   :  { %v1089_v5 = vmul.f32 1.442695, %v1065_v8  ;;  %v1066_v34 = vsub.f32 %v3664_v48, %v1038_v42 }
 0x3d3   :  { %v1041_v35 = vpop.xlane.xlu0 %1040 }
 0x3d4   :  { %3007 = vpow2.f32 %v1089_v5  ;;  %v1091_v51 = vmul.f32 1.442695, %v1066_v34  ;;  %v1067_v44 = vsub.f32 %v3656_v33, %v1041_v35 }
 0x3d5   :  { %v1044_v26 = vpop.xlane.xlu1 %1043 }
 0x3d6   :  { %3009 = vpow2.f32 %v1091_v51  ;;  %v1093_v27 = vmul.f32 1.442695, %v1067_v44  ;;  %v1068_v10 = vsub.f32 %v3660_v11, %v1044_v26 }
 0x3d7   :  { %v1047_v49 = vpop.xlane.xlu0 %1046 }
 0x3d8   :  { %3011 = vpow2.f32 %v1093_v27  ;;  %v1095_v53 = vmul.f32 1.442695, %v1068_v10  ;;  %v1069_v39 = vsub.f32 %v3674_v2, %v1047_v49 }
 0x3d9   :  { %v1050_v20 = vpop.xlane.xlu1 %1049 }
 0x3da   :  { %3013 = vpow2.f32 %v1095_v53  ;;  %v1097_v38 = vmul.f32 1.442695, %v1069_v39  ;;  %v1070_v48 = vsub.f32 %v3680_v12, %v1050_v20 }
 0x3db   :  { %v1053_v60 = vpop.xlane.xlu0 %1052 }
 0x3dc   :  { %3015 = vpow2.f32 %v1097_v38  ;;  %v1099_v43 = vmul.f32 1.442695, %v1070_v48  ;;  %v1071_v33 = vsub.f32 %v3670_v55, %v1053_v60  ;;  %v2943_v38 = vld [vmem:[#allocation9] sm:$0xff]   ;;  %v2944_v48 = vld [vmem:[#allocation9 + $0x8] sm:$0xff]   ;;  %v2945_v60 = vld [vmem:[#allocation9 + $0x10] sm:$0xff]  }
 0x3dd   :  { %v1056_v46 = vpop.xlane.xlu1 %1055  ;;  %2835 = vmatprep.subr.bf16.mxu0 %v2943_v38 }
 0x3de   :  { %v3729_v8 = vpop.eup %3007  ;;  %3017 = vpow2.f32 %v1099_v43  ;;  %v1101_v11 = vmul.f32 1.442695, %v1071_v33  ;;  %v1072_v42 = vsub.f32 %v3676_v4, %v1056_v46  ;;  %2836 = vmatpush3.bf16.msra.mxu0 %v2943_v38  ;;  %v2946_v43 = vld [vmem:[#allocation9 + $0x18] sm:$0xff]   ;;  %v2947_v33 = vld [vmem:[#allocation9 + $0x20] sm:$0xff]   ;;  %v2948_v46 = vld [vmem:[#allocation9 + $0x28] sm:$0xff]  }
 0x3df   :  { %v1129_v2 = vsel %vm1008_vm1, %v3729_v8, 0.0  ;;  %2837 = vmatprep.subr.bf16.mxu0 %v2944_v48 }
 0x3e0   :  { %v3734_v5 = vpop.eup %3009  ;;  %3019 = vpow2.f32 %v1101_v11  ;;  %v1103_v34 = vmul.f32 1.442695, %v1072_v42  ;;  %1130 = vadd.xlane.f32.xlu0 %v1129_v2  ;;  %v2949_v11 = vld [vmem:[#allocation9 + $0x30] sm:$0xff]  }
 0x3e1   :  { %v1132_v12 = vsel %vm1008_vm1, %v3734_v5, 0.0 }
 0x3e2   :  { %v3738_v35 = vpop.eup %3011  ;;  %3021 = vpow2.f32 %v1103_v34  ;;  %1133 = vadd.xlane.f32.xlu1 %v1132_v12  ;;  %2838 = vmatpush3.bf16.msra.mxu0 %v2944_v48 }
 0x3e3   :  { %v1135_v55 = vsel %vm1008_vm1, %v3738_v35, 0.0  ;;  %2839 = vmatprep.subr.bf16.mxu0 %v2945_v60 }
 0x3e4   :  { %v3742_v51 = vpop.eup %3013  ;;  %1136 = vadd.xlane.f32.xlu0 %v1135_v55 }
 0x3e5   :  { %v1138_v4 = vsel %vm1008_vm1, %v3742_v51, 0.0 }
 0x3e6   :  { %v3746_v44 = vpop.eup %3015  ;;  %1139 = vadd.xlane.f32.xlu1 %v1138_v4  ;;  %2840 = vmatpush3.bf16.msra.mxu0 %v2945_v60 }
 0x3e7   :  { %v1141_v26 = vsel %vm1008_vm1, %v3746_v44, 0.0  ;;  %2841 = vmatprep.subr.bf16.mxu0 %v2946_v43 }
 0x3e8   :  { %v3750_v27 = vpop.eup %3017  ;;  %1142 = vadd.xlane.f32.xlu0 %v1141_v26 }
 0x3e9   :  { %v1144_v10 = vsel %vm1008_vm1, %v3750_v27, 0.0 }
 0x3ea   :  { %v3754_v49 = vpop.eup %3019  ;;  %1145 = vadd.xlane.f32.xlu1 %v1144_v10  ;;  %2842 = vmatpush3.bf16.msra.mxu0 %v2946_v43 }
 0x3eb   :  { %v1147_v53 = vsel %vm1008_vm1, %v3754_v49, 0.0  ;;  %2843 = vmatprep.subr.bf16.mxu0 %v2947_v33 }
 0x3ec   :  { %v3758_v39 = vpop.eup %3021  ;;  %1148 = vadd.xlane.f32.xlu0 %v1147_v53 }
 0x3ed   :  { %v1150_v20 = vsel %vm1008_vm1, %v3758_v39, 0.0 }
 0x3ee   :  { %1151 = vadd.xlane.f32.xlu1 %v1150_v20  ;;  %2844 = vmatpush3.bf16.msra.mxu0 %v2947_v33 }
 0x3ef   :  { %2845 = vmatprep.subr.bf16.mxu0 %v2948_v46 }
 0x3f2   :  { %2846 = vmatpush3.bf16.msra.mxu0 %v2948_v46 }
 0x3f3   :  { %2847 = vmatprep.subr.bf16.mxu0 %v2949_v11 }
 0x3f6   :  { %2848 = vmatpush3.bf16.msra.mxu0 %v2949_v11 }
 0x44d   :  { %v1107_v42 = vpop.xlane.xlu0 %1106 }
 0x44e   :  { %3023 = vrcp.f32 %v1107_v42 }
 0x451   :  { %v1113_v2 = vpop.xlane.xlu0 %1112  ;;  %v1110_v34 = vpop.xlane.xlu1 %1109 }
 0x452   :  { %3025 = vrcp.f32 %v1110_v34 }
 0x453   :  { %3027 = vrcp.f32 %v1113_v2 }
 0x455   :  { %v1119_v12 = vpop.xlane.xlu0 %1118  ;;  %v1116_v55 = vpop.xlane.xlu1 %1115 }
 0x456   :  { %3029 = vrcp.f32 %v1116_v55 }
 0x457   :  { %3031 = vrcp.f32 %v1119_v12 }
 0x458   :  { %v3024_v10 = vpop.eup %3023 }
 0x459   :  { %v1125_v4 = vpop.xlane.xlu0 %1124  ;;  %v1122_v26 = vpop.xlane.xlu1 %1121  ;;  %v1169_v38 = vmul.f32 %v3024_v10, %v3689_v36 }
 0x45a   :  { %3033 = vrcp.f32 %v1122_v26 }
 0x45b   :  { %3035 = vrcp.f32 %v1125_v4 }
 0x45c   :  { %v3026_v53 = vpop.eup %3025 }
 0x45d   :  { %v1128_v20 = vpop.xlane.xlu1 %1127  ;;  %v1170_v48 = vmul.f32 %v3026_v53, %v3696_v13  ;;  %v3028_v60 = vpop.eup %3027 }
 0x45e   :  { %3037 = vrcp.f32 %v1128_v20  ;;  %v1171_v46 = vmul.f32 %v3028_v60, %v3694_v18 }
 0x45f   :  { %v1185_v43 = vpack.c.bf16 %v1170_v48, %v1169_v38 }
 0x460   :  { %v3030_v33 = vpop.eup %3029 }
 0x461   :  { %v1172_v11 = vmul.f32 %v3030_v33, %v3702_v23  ;;  %2811 = vmatprep.mubr.msk.bf16.mxu1 %vm1008_vm1, %v1185_v43  ;;  %v3032_v42 = vpop.eup %3031 }
 0x462   :  { %v1173_v55 = vmul.f32 %v3032_v42, %v3704_v6 }
 0x463   :  { %v1186_v2 = vpack.c.bf16 %v1172_v11, %v1171_v46 }
 0x464   :  { %v3034_v34 = vpop.eup %3033 }
 0x465   :  { %v3036_v12 = vpop.eup %3035  ;;  %2812 = vmatmul.mubr.msk.bf16.vlgmr.msra.gmra.mrb[32].mxu1 %vm1008_vm1, %v1186_v2  ;;  %v1174_v36 = vmul.f32 %v3034_v34, %v3710_v15 }
 0x466   :  { %2820 = vmatpush3.bf16.msra.mxu1 %v3600_v16  ;;  %v1175_v23 = vmul.f32 %v3036_v12, %v3712_v17 }
 0x467   :  { %2821 = vmatprep.subr.bf16.mxu1 %v3598_v19  ;;  %v1187_v18 = vpack.c.bf16 %v1174_v36, %v1173_v55 }
 0x468   :  { %v3038_v13 = vpop.eup %3037 }
 0x469   :  { %v1176_v4 = vmul.f32 %v3038_v13, %v3718_v28  ;;  %2815 = vmatprep.mubr.msk.bf16.mxu1 %vm1008_vm1, %v1187_v18  ;;  %v2950_v13 = vld [vmem:[#allocation9 + $0x38] sm:$0xff]  }
 0x46a   :  { %2822 = vmatpush3.bf16.msra.mxu1 %v3598_v19  ;;  %2849 = vmatprep.subr.bf16.mxu0 %v2950_v13 }
 0x46b   :  { %v1188_v26 = vpack.c.bf16 %v1176_v4, %v1175_v23  ;;  %2823 = vmatprep.subr.bf16.mxu1 %v3612_v30  ;;  %2850 = vmatpush3.bf16.msra.mxu0 %v2950_v13 }
 0x46d   :  { %v1131_v6 = vpop.xlane.xlu0 %1130  ;;  %2816 = vmatmul.mubr.msk.bf16.gmra.mrb[36].mxu1 %vm1008_vm1, %v1188_v26 }
 0x46e   :  { %3039 = vrcp.f32 %v1131_v6  ;;  %2824 = vmatpush3.bf16.msra.mxu1 %v3612_v30 }
 0x46f   :  { %v1134_v16 = vpop.xlane.xlu1 %1133  ;;  %2825 = vmatprep.subr.bf16.mxu1 %v3610_v29 }
 0x470   :  { %3041 = vrcp.f32 %v1134_v16 }
 0x471   :  { %v1137_v15 = vpop.xlane.xlu0 %1136 }
 0x472   :  { %3043 = vrcp.f32 %v1137_v15  ;;  %2826 = vmatpush3.bf16.msra.mxu1 %v3610_v29 }
 0x473   :  { %v1140_v17 = vpop.xlane.xlu1 %1139 }
 0x474   :  { %3045 = vrcp.f32 %v1140_v17 }
 0x475   :  { %v1143_v19 = vpop.xlane.xlu0 %1142 }
 0x476   :  { %3047 = vrcp.f32 %v1143_v19 }
 0x477   :  { %v1146_v28 = vpop.xlane.xlu1 %1145 }
 0x478   :  { %v3040_v10 = vpop.eup %3039  ;;  %3049 = vrcp.f32 %v1146_v28 }
 0x479   :  { %v1149_v53 = vpop.xlane.xlu0 %1148  ;;  %v1177_v30 = vmul.f32 %v3040_v10, %v3729_v8 }
 0x47a   :  { %v3042_v20 = vpop.eup %3041  ;;  %3051 = vrcp.f32 %v1149_v53 }
 0x47b   :  { %v1152_v38 = vpop.xlane.xlu1 %1151  ;;  %v1178_v48 = vmul.f32 %v3042_v20, %v3734_v5 }
 0x47c   :  { %v3044_v60 = vpop.eup %3043  ;;  %3053 = vrcp.f32 %v1152_v38 }
 0x47d   :  { %v1189_v43 = vpack.c.bf16 %v1178_v48, %v1177_v30  ;;  %v1179_v29 = vmul.f32 %v3044_v60, %v3738_v35 }
 0x47e   :  { %v3046_v33 = vpop.eup %3045 }
 0x47f   :  { %v1180_v46 = vmul.f32 %v3046_v33, %v3742_v51  ;;  %2827 = vmatprep.mubr.msk.bf16.mxu1 %vm1008_vm1, %v1189_v43 }
 0x480   :  { %v3048_v11 = vpop.eup %3047 }
 0x481   :  { %v1190_v42 = vpack.c.bf16 %v1180_v46, %v1179_v29  ;;  %v1181_v34 = vmul.f32 %v3048_v11, %v3746_v44  ;;  %v1373_v46 = vsub.s32 4, %v3446_v40  ;;  %v3798_v11 = vld [vmem:[%s4397_s6] sm:$0xff] }
 0x482   :  { %v3050_v2 = vpop.eup %3049 }
 0x483   :  { %2828 = vmatmul.mubr.msk.bf16.vlgmr.msra.gmra.mrb[40].mxu1 %vm1008_vm1, %v1190_v42  ;;  %v1182_v8 = vmul.f32 %v3050_v2, %v3750_v27  ;;  %v1374_v42 = vrot.slane %v3798_v11, %v1373_v46 }
 0x484   :  { %v3052_v5 = vpop.eup %3051 }
 0x485   :  { %v1191_v12 = vpack.c.bf16 %v1182_v8, %v1181_v34  ;;  %v1183_v35 = vmul.f32 %v3052_v5, %v3754_v49 }
 0x486   :  { %v3054_v55 = vpop.eup %3053 }
 0x487   :  { %2831 = vmatprep.mubr.msk.bf16.mxu1 %vm1008_vm1, %v1191_v12  ;;  %v1184_v51 = vmul.f32 %v3054_v55, %v3758_v39 }
 0x489   :  { %v1192_v36 = vpack.c.bf16 %v1184_v51, %v1183_v35 }
 0x48b   :  { %2832 = vmatmul.mubr.msk.bf16.gmra.mrb[44].mxu1 %vm1008_vm1, %v1192_v36 }
 0x48c   :  { %1901 = vmatprep.mubr.bf16.mxu1 %v3299_v0 }
 0x538   :  { %v2813_v44 = vpop.f32.mrb[32].mxu1 }
 0x539   :  { %v1239_v18 = vpop.f32.mrb[33].mxu1 }
 0x53a   :  { %v2814_v27 = vpop.f32.mrb[34].mxu1 }
 0x53b   :  { %v1348_v23 = vpack.c.bf16 %v2814_v27, %v2813_v44  ;;  %v1242_v4 = vpop.f32.mrb[35].mxu1 }
 0x53c   :  { %v1347_v26 = vpack.c.bf16 %v1242_v4, %v1239_v18 }
 0x53e   :  { %2851 = vmatprep.mubr.bf16.mxu0 %v1347_v26 }
 0x53f   :  { %2852 = vmatmul.mubr.bf16.vlgmr.msra.gmra.mrb[48].mxu0 %v1348_v23 }
 0x540   :  { %v2817_v6 = vpop.f32.mrb[36].mxu1 }
 0x541   :  { %v1255_v49 = vpop.f32.mrb[37].mxu1 }
 0x542   :  { %v2818_v16 = vpop.f32.mrb[38].mxu1 }
 0x543   :  { %v1350_v39 = vpack.c.bf16 %v2818_v16, %v2817_v6  ;;  %v1258_v15 = vpop.f32.mrb[39].mxu1 }
 0x544   :  { %v1349_v17 = vpack.c.bf16 %v1258_v15, %v1255_v49  ;;  %v4410_v15 = vmax.f32 %v3492_v7, 0.0 }
 0x546   :  { %2855 = vmatprep.mubr.bf16.mxu0 %v1349_v17 }
 0x547   :  { %2856 = vmatmul.mubr.bf16.gmra.mrb[52].mxu0 %v1350_v39 }
 0x556   :  { %v2829_v19 = vpop.f32.mrb[40].mxu1 }
 0x557   :  { %v1316_v28 = vpop.f32.mrb[41].mxu1 }
 0x558   :  { %v2830_v10 = vpop.f32.mrb[42].mxu1 }
 0x559   :  { %v1352_v53 = vpack.c.bf16 %v2830_v10, %v2829_v19  ;;  %v1319_v20 = vpop.f32.mrb[43].mxu1 }
 0x55a   :  { %v1351_v38 = vpack.c.bf16 %v1319_v20, %v1316_v28  ;;  %v4412_v28 = vmax.f32 %v3505_v21, 0.0 }
 0x55c   :  { %2859 = vmatprep.mubr.bf16.mxu0 %v1351_v38  ;;  %v4413_v38 = vmax.f32 %v3507_v22, 0.0  ;;  %v4416_v22 = vmax.f32 %v3526_v31, 0.0 }
 0x55d   :  { %2860 = vmatmul.mubr.bf16.gmra.mrb[56].mxu0 %v1352_v53 }
 0x55e   :  { %v2833_v30 = vpop.f32.mrb[44].mxu1 }
 0x55f   :  { %v1332_v48 = vpop.f32.mrb[45].mxu1 }
 0x560   :  { %v2834_v60 = vpop.f32.mrb[46].mxu1 }
 0x561   :  { %v1354_v43 = vpack.c.bf16 %v2834_v60, %v2833_v30  ;;  %v1335_v33 = vpop.f32.mrb[47].mxu1 }
 0x562   :  { %v1353_v29 = vpack.c.bf16 %v1335_v33, %v1332_v48 }
 0x564   :  { %2863 = vmatprep.mubr.bf16.mxu0 %v1353_v29  ;;  %v4415_v29 = vmax.f32 %v3515_v25, 0.0  ;;  %v2954_v25 = vld [vmem:[#allocation11 + $0x10] ss:$8 sps:$4 sm:$0xff]  }
 0x565   :  { %2864 = vmatmul.mubr.bf16.gmra.mrb[60].mxu0 %v1354_v43  ;;  %v4414_v43 = vmax.f32 %v3513_v24, 0.0 }
 0x612   :  { %v2853_v2 = vpop.f32.mrb[48].mxu0 }
 0x613   :  { %v1457_v34 = vpop.f32.mrb[49].mxu0  ;;  %v1466_v55 = vadd.f32 %v2853_v2, %v1374_v42 }
 0x614   :  { %v1458_v8 = vadd.f32 %v1457_v34, %v1374_v42  ;;  %v2854_v5 = vpop.f32.mrb[50].mxu0  ;;  %v4417_v34 = vmax.f32 %v3528_v32, 0.0 }
 0x615   :  { %v1460_v12 = vpop.f32.mrb[51].mxu0  ;;  %v1469_v36 = vadd.f32 %v2854_v5, %v1374_v42  ;;  %v3813_v18 = vadd.f32 %v1466_v55, %v402_v61  ;;  %v2956_v5 = vld [vmem:[#allocation11 + $0x14] ss:$8 sps:$4 sm:$0xff]  }
 0x616   :  { %v1461_v35 = vadd.f32 %v1460_v12, %v1374_v42  ;;  %v3803_v51 = vadd.f32 %v1458_v8, %v400_v56  ;;  %v2953_v8 = vld [vmem:[#allocation11 + $0x4] ss:$8 sps:$4 sm:$0xff]  }
 0x617   :  { %v3818_v56 = vadd.f32 %v1469_v36, %v403_v62  ;;  %v4409_v62 = vmax.f32 %v3477_v1, 0.0  ;;  %v4411_v1 = vmax.f32 %v3498_v14, 0.0  ;;  %1869 = vmatprep.subr.bf16.mxu1 %v2953_v8  ;;  %v2966_v8 = vld [vmem:[#allocation11 + $0x50] ss:$8 sps:$4 sm:$0xff]  }
 0x618   :  { %1536 = vadd.xlane.f32.xlu0 %v3803_v51  ;;  %v3808_v13 = vadd.f32 %v1461_v35, %v401_v57 }
 0x61a   :  { %1538 = vadd.xlane.f32.xlu1 %v3808_v13  ;;  %v2857_v44 = vpop.f32.mrb[52].mxu0 }
 0x61b   :  { %v1473_v27 = vpop.f32.mrb[53].mxu0  ;;  %v1482_v50 = vadd.f32 %v2857_v44, %v1374_v42 }
 0x61c   :  { %v1474_v23 = vadd.f32 %v1473_v27, %v1374_v42  ;;  %1540 = vadd.xlane.f32.xlu0 %v3813_v18  ;;  %v2858_v45 = vpop.f32.mrb[54].mxu0 }
 0x61d   :  { %v1476_v4 = vpop.f32.mrb[55].mxu0  ;;  %v1485_v47 = vadd.f32 %v2858_v45, %v1374_v42  ;;  %v3833_v54 = vadd.f32 %v1482_v50, %v406_v9 }
 0x61e   :  { %v1477_v57 = vadd.f32 %v1476_v4, %v1374_v42  ;;  %1542 = vadd.xlane.f32.xlu1 %v3818_v56  ;;  %v3823_v26 = vadd.f32 %v1474_v23, %v404_v58 }
 0x61f   :  { %v3838_v52 = vadd.f32 %v1485_v47, %v4409_v62 }
 0x620   :  { %1544 = vadd.xlane.f32.xlu0 %v3823_v26  ;;  %v3828_v61 = vadd.f32 %v1477_v57, %v405_v3 }
 0x622   :  { %1546 = vadd.xlane.f32.xlu1 %v3828_v61 }
 0x624   :  { %1548 = vadd.xlane.f32.xlu0 %v3833_v54 }
 0x626   :  { %1550 = vadd.xlane.f32.xlu1 %v3838_v52 }
 0x630   :  { %v2861_v58 = vpop.f32.mrb[56].mxu0 }
 0x631   :  { %v1489_v6 = vpop.f32.mrb[57].mxu0  ;;  %v1498_v16 = vadd.f32 %v2861_v58, %v1374_v42 }
 0x632   :  { %v1490_v49 = vadd.f32 %v1489_v6, %v1374_v42  ;;  %v2862_v59 = vpop.f32.mrb[58].mxu0 }
 0x633   :  { %v1492_v3 = vpop.f32.mrb[59].mxu0  ;;  %v1501_v9 = vadd.f32 %v2862_v59, %v1374_v42  ;;  %v3853_v10 = vadd.f32 %v1498_v16, %v4412_v28  ;;  %v2959_v28 = vld [vmem:[#allocation11 + $0x24] ss:$8 sps:$4 sm:$0xff]  }
 0x634   :  { %v1493_v39 = vadd.f32 %v1492_v3, %v1374_v42  ;;  %v3843_v63 = vadd.f32 %v1490_v49, %v4410_v15 }
 0x635   :  { %v3858_v30 = vadd.f32 %v1501_v9, %v4413_v38 }
 0x636   :  { %1552 = vadd.xlane.f32.xlu0 %v3843_v63  ;;  %v3848_v17 = vadd.f32 %v1493_v39, %v4411_v1 }
 0x638   :  { %1554 = vadd.xlane.f32.xlu1 %v3848_v17  ;;  %v2865_v19 = vpop.f32.mrb[60].mxu0 }
 0x639   :  { %v1505_v53 = vpop.f32.mrb[61].mxu0  ;;  %v1514_v14 = vadd.f32 %v2865_v19, %v1374_v42 }
 0x63a   :  { %v1506_v20 = vadd.f32 %v1505_v53, %v1374_v42  ;;  %1556 = vadd.xlane.f32.xlu0 %v3853_v10  ;;  %v2866_v7 = vpop.f32.mrb[62].mxu0  ;;  %v2962_v53 = vld [vmem:[#allocation11 + $0x34] ss:$8 sps:$4 sm:$0xff]  }
 0x63b   :  { %v1508_v48 = vpop.f32.mrb[63].mxu0  ;;  %v1517_v21 = vadd.f32 %v2866_v7, %v1374_v42  ;;  %v3873_v2 = vadd.f32 %v1514_v14, %v4416_v22 }
 0x63c   :  { %v1509_v60 = vadd.f32 %v1508_v48, %v1374_v42  ;;  %1558 = vadd.xlane.f32.xlu1 %v3858_v30  ;;  %v3863_v33 = vadd.f32 %v1506_v20, %v4414_v43  ;;  %v2951_v42 = vld [vmem:[#allocation11] ss:$8 sps:$4 sm:$0xff]   ;;  %v2960_v20 = vld [vmem:[#allocation11 + $0x30] ss:$8 sps:$4 sm:$0xff]  }
 0x63d   :  { %v3878_v24 = vadd.f32 %v1517_v21, %v4417_v34  ;;  %1870 = vmatpush1.bf16.msra.mxu1 %v2951_v42  ;;  %v2963_v48 = vld [vmem:[#allocation11 + $0x40] ss:$8 sps:$4 sm:$0xff]  }
 0x63e   :  { %1560 = vadd.xlane.f32.xlu0 %v3863_v33  ;;  %v3868_v46 = vadd.f32 %v1509_v60, %v4415_v29  ;;  %1871 = vmatprep.subr.bf16.mxu1 %v2956_v5  ;;  %v2968_v29 = vld [vmem:[#allocation11 + $0x54] ss:$8 sps:$4 sm:$0xff]  }
 0x640   :  { %1562 = vadd.xlane.f32.xlu1 %v3868_v46 }
 0x641   :  { %1872 = vmatpush1.bf16.msra.mxu1 %v2954_v25 }
 0x642   :  { %1564 = vadd.xlane.f32.xlu0 %v3873_v2  ;;  %1873 = vmatprep.subr.bf16.mxu1 %v2959_v28  ;;  %v3978_v28 = vld [vmem:[#allocation12 + $0x18] sm:$0xff]  }
 0x644   :  { %1566 = vadd.xlane.f32.xlu1 %v3878_v24 }
 0x6a5   :  { %v1537_v12 = vpop.xlane.xlu0 %1536 }
 0x6a6   :  { %v1569_v31 = vmul.f32 0.0078125, %v1537_v12 }
 0x6a7   :  { %v1539_v55 = vpop.xlane.xlu1 %1538 }
 0x6a8   :  { %v3882_v35 = vsub.f32 %v3803_v51, %v1569_v31  ;;  %v1570_v36 = vmul.f32 0.0078125, %v1539_v55  ;;  %v2971_v55 = vld [vmem:[#allocation11 + $0x64] ss:$8 sps:$4 sm:$0xff]  }
 0x6a9   :  { %v1541_v32 = vpop.xlane.xlu0 %1540 }
 0x6aa   :  { %v3885_v44 = vsub.f32 %v3808_v13, %v1570_v36  ;;  %v1571_v27 = vmul.f32 0.0078125, %v1541_v32  ;;  %v1601_v23 = vmul.f32 %v3882_v35, %v3882_v35 }
 0x6ab   :  { %v1543_v45 = vpop.xlane.xlu1 %1542 }
 0x6ac   :  { %v3890_v4 = vsub.f32 %v3813_v18, %v1571_v27  ;;  %v1572_v50 = vmul.f32 0.0078125, %v1543_v45  ;;  %1617 = vadd.xlane.f32.xlu0 %v1601_v23  ;;  %v1602_v57 = vmul.f32 %v3885_v44, %v3885_v44  ;;  %v2969_v27 = vld [vmem:[#allocation11 + $0x60] ss:$8 sps:$4 sm:$0xff]  }
 0x6ad   :  { %v1545_v51 = vpop.xlane.xlu0 %1544 }
 0x6ae   :  { %v3895_v47 = vsub.f32 %v3818_v56, %v1572_v50  ;;  %v1573_v62 = vmul.f32 0.0078125, %v1545_v51  ;;  %1619 = vadd.xlane.f32.xlu1 %v1602_v57  ;;  %v1603_v13 = vmul.f32 %v3890_v4, %v3890_v4  ;;  %v2972_v57 = vld [vmem:[#allocation11 + $0x70] ss:$8 sps:$4 sm:$0xff]  }
 0x6af   :  { %v1547_v58 = vpop.xlane.xlu1 %1546 }
 0x6b0   :  { %v3900_v6 = vsub.f32 %v3823_v26, %v1573_v62  ;;  %v1574_v18 = vmul.f32 0.0078125, %v1547_v58  ;;  %1621 = vadd.xlane.f32.xlu0 %v1603_v13  ;;  %v1604_v49 = vmul.f32 %v3895_v47, %v3895_v47 }
 0x6b1   :  { %v1549_v59 = vpop.xlane.xlu0 %1548 }
 0x6b2   :  { %v3905_v3 = vsub.f32 %v3828_v61, %v1574_v18  ;;  %v1575_v56 = vmul.f32 0.0078125, %v1549_v59  ;;  %1623 = vadd.xlane.f32.xlu1 %v1604_v49  ;;  %v1605_v16 = vmul.f32 %v3900_v6, %v3900_v6 }
 0x6b3   :  { %v1551_v39 = vpop.xlane.xlu1 %1550 }
 0x6b4   :  { %v3910_v15 = vsub.f32 %v3833_v54, %v1575_v56  ;;  %v1576_v26 = vmul.f32 0.0078125, %v1551_v39  ;;  %1625 = vadd.xlane.f32.xlu0 %v1605_v16  ;;  %v1606_v9 = vmul.f32 %v3905_v3, %v3905_v3  ;;  %v2957_v54 = vld [vmem:[#allocation11 + $0x20] ss:$8 sps:$4 sm:$0xff]  }
 0x6b5   :  { %1874 = vmatpush1.bf16.msra.mxu1 %v2957_v54  ;;  %v3961_v39 = vld [vmem:[#allocation12] sm:$0xff]  }
 0x6b6   :  { %v3915_v1 = vsub.f32 %v3838_v52, %v1576_v26  ;;  %1627 = vadd.xlane.f32.xlu1 %v1606_v9  ;;  %v1607_v61 = vmul.f32 %v3910_v15, %v3910_v15  ;;  %1875 = vmatprep.subr.bf16.mxu1 %v2962_v53  ;;  %v2965_v52 = vld [vmem:[#allocation11 + $0x44] ss:$8 sps:$4 sm:$0xff]   ;;  %v3969_v9 = vld [vmem:[#allocation12 + $0x50] sm:$0xff]  }
 0x6b7   :  { %v3963_v26 = vld [vmem:[#allocation12 + $0x48] sm:$0xff]   ;;  %v3981_v54 = vld [vmem:[#allocation12 + $0x60] sm:$0xff]  }
 0x6b8   :  { %1629 = vadd.xlane.f32.xlu0 %v1607_v61  ;;  %v1608_v19 = vmul.f32 %v3915_v1, %v3915_v1  ;;  %v3972_v61 = vld [vmem:[#allocation12 + $0x10] sm:$0xff]   ;;  %v3984_v53 = vld [vmem:[#allocation12 + $0x20] sm:$0xff]  }
 0x6b9   :  { %1876 = vmatpush1.bf16.msra.mxu1 %v2960_v20  ;;  %v3987_v20 = vld [vmem:[#allocation12 + $0x68] sm:$0xff]  }
 0x6ba   :  { %1631 = vadd.xlane.f32.xlu1 %v1608_v19  ;;  %1877 = vmatprep.subr.bf16.mxu1 %v2965_v52  ;;  %v3975_v19 = vld [vmem:[#allocation12 + $0x58] sm:$0xff]  }
 0x6bd   :  { %1878 = vmatpush1.bf16.msra.mxu1 %v2963_v48 }
 0x6be   :  { %1879 = vmatprep.subr.bf16.mxu1 %v2968_v29 }
 0x6c1   :  { %1880 = vmatpush1.bf16.msra.mxu1 %v2966_v8 }
 0x6c2   :  { %1881 = vmatprep.subr.bf16.mxu1 %v2971_v55 }
 0x6c3   :  { %v1553_v7 = vpop.xlane.xlu0 %1552 }
 0x6c4   :  { %v1577_v38 = vmul.f32 0.0078125, %v1553_v7 }
 0x6c5   :  { %v1555_v14 = vpop.xlane.xlu1 %1554  ;;  %1882 = vmatpush1.bf16.msra.mxu1 %v2969_v27 }
 0x6c6   :  { %v3922_v60 = vsub.f32 %v3843_v63, %v1577_v38  ;;  %v1578_v43 = vmul.f32 0.0078125, %v1555_v14 }
 0x6c7   :  { %v1557_v21 = vpop.xlane.xlu0 %1556 }
 0x6c8   :  { %v3925_v22 = vsub.f32 %v3848_v17, %v1578_v43  ;;  %v1579_v34 = vmul.f32 0.0078125, %v1557_v21  ;;  %v1609_v42 = vmul.f32 %v3922_v60, %v3922_v60 }
 0x6c9   :  { %v1559_v5 = vpop.xlane.xlu1 %1558 }
 0x6ca   :  { %v3930_v25 = vsub.f32 %v3853_v10, %v1579_v34  ;;  %v1580_v12 = vmul.f32 0.0078125, %v1559_v5  ;;  %1633 = vadd.xlane.f32.xlu0 %v1609_v42  ;;  %v1610_v63 = vmul.f32 %v3925_v22, %v3925_v22 }
 0x6cb   :  { %v1561_v31 = vpop.xlane.xlu0 %1560 }
 0x6cc   :  { %v3935_v17 = vsub.f32 %v3858_v30, %v1580_v12  ;;  %v1581_v36 = vmul.f32 0.0078125, %v1561_v31  ;;  %1635 = vadd.xlane.f32.xlu1 %v1610_v63  ;;  %v1611_v32 = vmul.f32 %v3930_v25, %v3930_v25  ;;  %v2974_v30 = vld [vmem:[#allocation11 + $0x74] ss:$8 sps:$4 sm:$0xff]   ;;  %v1715_v31 = vsub.s32 5, %v3446_v40 }
 0x6cd   :  { %v1563_v23 = vpop.xlane.xlu1 %1562  ;;  %1883 = vmatprep.subr.bf16.mxu1 %v2974_v30 }
 0x6ce   :  { %v3940_v10 = vsub.f32 %v3863_v33, %v1581_v36  ;;  %v1582_v45 = vmul.f32 0.0078125, %v1563_v23  ;;  %1637 = vadd.xlane.f32.xlu0 %v1611_v32  ;;  %v1612_v50 = vmul.f32 %v3935_v17, %v3935_v17  ;;  %1884 = vmatpush1.bf16.msra.mxu1 %v2972_v57  ;;  %v3993_v23 = vrot.slane %v3798_v11, %v1715_v31 }
 0x6cf   :  { %v1565_v51 = vpop.xlane.xlu0 %1564  ;;  %v1735_v57 = vsub.s32 6, %v3446_v40 }
 0x6d0   :  { %v3945_v62 = vsub.f32 %v3868_v46, %v1582_v45  ;;  %v1583_v13 = vmul.f32 0.0078125, %v1565_v51  ;;  %1639 = vadd.xlane.f32.xlu1 %v1612_v50  ;;  %v1613_v58 = vmul.f32 %v3940_v10, %v3940_v10 }
 0x6d1   :  { %v1567_v33 = vpop.xlane.xlu1 %1566 }
 0x6d2   :  { %v3950_v18 = vsub.f32 %v3873_v2, %v1583_v13  ;;  %v1584_v49 = vmul.f32 0.0078125, %v1567_v33  ;;  %1641 = vadd.xlane.f32.xlu0 %v1613_v58  ;;  %v1614_v59 = vmul.f32 %v3945_v62, %v3945_v62  ;;  %v2975_v2 = vld [vmem:[#allocation12 + $0x40] sm:$0xff]  }
 0x6d3   :  { %2675 = vmatprep.subr.bf16.mxu0 %v2975_v2  ;;  %2867 = vmatprep.subr.bf16.mxu1 %v2975_v2 }
 0x6d4   :  { %v3955_v56 = vsub.f32 %v3878_v24, %v1584_v49  ;;  %1643 = vadd.xlane.f32.xlu1 %v1614_v59  ;;  %v1615_v46 = vmul.f32 %v3950_v18, %v3950_v18  ;;  %2676 = vmatpush3.bf16.msra.mxu0 %v3961_v39  ;;  %v3966_v24 = vld [vmem:[#allocation12 + $0x8] sm:$0xff]  }
 0x6d5   :  { %2677 = vmatprep.subr.bf16.mxu0 %v3963_v26 }
 0x6d6   :  { %1645 = vadd.xlane.f32.xlu0 %v1615_v46  ;;  %v1616_v16 = vmul.f32 %v3955_v56, %v3955_v56  ;;  %v4000_v46 = vrot.slane %v3798_v11, %v1735_v57 }
 0x6d8   :  { %1647 = vadd.xlane.f32.xlu1 %v1616_v16  ;;  %2678 = vmatpush3.bf16.msra.mxu0 %v3966_v24 }
 0x6d9   :  { %2679 = vmatprep.subr.bf16.mxu0 %v3969_v9 }
 0x6dc   :  { %2680 = vmatpush3.bf16.msra.mxu0 %v3972_v61 }
 0x6dd   :  { %2681 = vmatprep.subr.bf16.mxu0 %v3975_v19 }
 0x6e0   :  { %2682 = vmatpush3.bf16.msra.mxu0 %v3978_v28 }
 0x6e1   :  { %2683 = vmatprep.subr.bf16.mxu0 %v3981_v54 }
 0x6e4   :  { %2684 = vmatpush3.bf16.msra.mxu0 %v3984_v53 }
 0x6e5   :  { %2685 = vmatprep.subr.bf16.mxu0 %v3987_v20 }
 0x739   :  { %v1618_v7 = vpop.xlane.xlu0 %1617 }
 0x73a   :  { %v1649_v52 = vmul.f32 0.0078125, %v1618_v7 }
 0x73b   :  { %v1620_v38 = vpop.xlane.xlu1 %1619 }
 0x73c   :  { %v1665_v48 = vadd.f32 1e-05, %v1649_v52  ;;  %v1650_v14 = vmul.f32 0.0078125, %v1620_v38 }
 0x73d   :  { %v1622_v43 = vpop.xlane.xlu0 %1621 }
 0x73e   :  { %3055 = vrsqrt.f32 %v1665_v48  ;;  %v1666_v21 = vadd.f32 1e-05, %v1650_v14  ;;  %v1651_v29 = vmul.f32 0.0078125, %v1622_v43 }
 0x73f   :  { %v1624_v34 = vpop.xlane.xlu1 %1623 }
 0x740   :  { %3057 = vrsqrt.f32 %v1666_v21  ;;  %v1667_v42 = vadd.f32 1e-05, %v1651_v29  ;;  %v1652_v8 = vmul.f32 0.0078125, %v1624_v34 }
 0x741   :  { %v1626_v5 = vpop.xlane.xlu0 %1625 }
 0x742   :  { %3059 = vrsqrt.f32 %v1667_v42  ;;  %v1668_v12 = vadd.f32 1e-05, %v1652_v8  ;;  %v1653_v63 = vmul.f32 0.0078125, %v1626_v5 }
 0x743   :  { %v1628_v55 = vpop.xlane.xlu1 %1627 }
 0x744   :  { %3061 = vrsqrt.f32 %v1668_v12  ;;  %v1654_v36 = vmul.f32 0.0078125, %v1628_v55  ;;  %v1669_v32 = vadd.f32 1e-05, %v1653_v63 }
 0x745   :  { %v1630_v45 = vpop.xlane.xlu0 %1629 }
 0x746   :  { %v1670_v27 = vadd.f32 1e-05, %v1654_v36  ;;  %v1655_v33 = vmul.f32 0.0078125, %v1630_v45 }
 0x747   :  { %v1632_v50 = vpop.xlane.xlu1 %1631 }
 0x748   :  { %v3056_v30 = vpop.eup %3055  ;;  %3063 = vrsqrt.f32 %v1670_v27  ;;  %v1656_v51 = vmul.f32 0.0078125, %v1632_v50  ;;  %v1671_v38 = vadd.f32 1e-05, %v1655_v33 }
 0x749   :  { %v1697_v13 = vmul.f32 %v3056_v30, %v3882_v35  ;;  %3065 = vrsqrt.f32 %v1669_v32 }
 0x74a   :  { %v3058_v58 = vpop.eup %3057  ;;  %v1672_v2 = vadd.f32 1e-05, %v1656_v51 }
 0x74b   :  { %v1717_v49 = vmul.f32 %v3993_v23, %v1697_v13  ;;  %v1698_v59 = vmul.f32 %v3058_v58, %v3885_v44 }
 0x74c   :  { %v3060_v16 = vpop.eup %3059  ;;  %3067 = vrsqrt.f32 %v1672_v2 }
 0x74d   :  { %v1718_v7 = vmul.f32 %v3993_v23, %v1698_v59  ;;  %v4004_v48 = vadd.f32 %v4000_v46, %v1717_v49  ;;  %v1699_v14 = vmul.f32 %v3060_v16, %v3890_v4  ;;  %3069 = vrsqrt.f32 %v1671_v38 }
 0x74e   :  { %v3062_v52 = vpop.eup %3061 }
 0x74f   :  { %v4007_v35 = vadd.f32 %v4000_v46, %v1718_v7  ;;  %v1700_v43 = vmul.f32 %v3062_v52, %v3895_v47  ;;  %v1719_v29 = vmul.f32 %v3993_v23, %v1699_v14 }
 0x751   :  { %v1753_v11 = vpack.c.bf16 %v4007_v35, %v4004_v48  ;;  %v1720_v44 = vmul.f32 %v3993_v23, %v1700_v43  ;;  %v4023_v5 = vadd.f32 %v4000_v46, %v1719_v29 }
 0x752   :  { %v3064_v21 = vpop.eup %3063 }
 0x753   :  { %1902 = vmatmul.mubr.bf16.vlgmr.msra.gmra.mrb[48].mxu1 %v1753_v11  ;;  %v3066_v34 = vpop.eup %3065  ;;  %v4018_v4 = vadd.f32 %v4000_v46, %v1720_v44  ;;  %v1702_v47 = vmul.f32 %v3064_v21, %v3905_v3 }
 0x754   :  { %1911 = vmatprep.mubr.bf16.mxu1 %v3299_v0  ;;  %2875 = vmatpush3.bf16.msra.mxu1 %v3961_v39  ;;  %v1701_v12 = vmul.f32 %v3066_v34, %v3900_v6 }
 0x755   :  { %2868 = vmatprep.subr.bf16.mxu1 %v3963_v26  ;;  %v1754_v39 = vpack.c.bf16 %v4018_v4, %v4023_v5  ;;  %v1722_v36 = vmul.f32 %v3993_v23, %v1702_v47 }
 0x756   :  { %v3068_v3 = vpop.eup %3067  ;;  %v1721_v6 = vmul.f32 %v3993_v23, %v1701_v12 }
 0x757   :  { %v1634_v42 = vpop.xlane.xlu0 %1633  ;;  %v3070_v45 = vpop.eup %3069  ;;  %v4035_v57 = vadd.f32 %v4000_v46, %v1722_v36 }
 0x758   :  { %v1657_v8 = vmul.f32 0.0078125, %v1634_v42  ;;  %2876 = vmatpush3.bf16.msra.mxu1 %v3966_v24  ;;  %v4040_v58 = vadd.f32 %v4000_v46, %v1721_v6  ;;  %v1703_v33 = vmul.f32 %v3070_v45, %v3910_v15 }
 0x759   :  { %v1636_v63 = vpop.xlane.xlu1 %1635  ;;  %2869 = vmatprep.subr.bf16.mxu1 %v3969_v9  ;;  %v1704_v9 = vmul.f32 %v3068_v3, %v3915_v1 }
 0x75a   :  { %v1673_v31 = vadd.f32 1e-05, %v1657_v8  ;;  %v1658_v55 = vmul.f32 0.0078125, %v1636_v63  ;;  %v1755_v59 = vpack.c.bf16 %v4035_v57, %v4040_v58  ;;  %v1723_v16 = vmul.f32 %v3993_v23, %v1703_v33 }
 0x75b   :  { %v1638_v26 = vpop.xlane.xlu0 %1637  ;;  %1912 = vmatmul.mubr.bf16.gmra.mrb[52].mxu1 %v1754_v39  ;;  %v1724_v1 = vmul.f32 %v3993_v23, %v1704_v9 }
 0x75c   :  { %3071 = vrsqrt.f32 %v1673_v31  ;;  %v1674_v32 = vadd.f32 1e-05, %v1658_v55  ;;  %v1659_v27 = vmul.f32 0.0078125, %v1638_v26  ;;  %1921 = vmatprep.mubr.bf16.mxu1 %v3299_v0  ;;  %2877 = vmatpush3.bf16.msra.mxu1 %v3972_v61  ;;  %v4056_v14 = vadd.f32 %v4000_v46, %v1723_v16 }
 0x75d   :  { %v1640_v50 = vpop.xlane.xlu1 %1639  ;;  %2870 = vmatprep.subr.bf16.mxu1 %v3975_v19  ;;  %v4052_v7 = vadd.f32 %v4000_v46, %v1724_v1  ;;  %v2988_v1 = vld [vmem:[#allocation12 + $0x30] sm:$0xff]  }
 0x75e   :  { %3073 = vrsqrt.f32 %v1674_v32  ;;  %v1660_v24 = vmul.f32 0.0078125, %v1640_v50  ;;  %v1675_v30 = vadd.f32 1e-05, %v1659_v27 }
 0x75f   :  { %v1642_v13 = vpop.xlane.xlu0 %1641 }
 0x760   :  { %v1676_v51 = vadd.f32 1e-05, %v1660_v24  ;;  %2878 = vmatpush3.bf16.msra.mxu1 %v3978_v28  ;;  %v1661_v19 = vmul.f32 0.0078125, %v1642_v13 }
 0x761   :  { %v1644_v49 = vpop.xlane.xlu1 %1643  ;;  %2871 = vmatprep.subr.bf16.mxu1 %v3981_v54 }
 0x762   :  { %3075 = vrsqrt.f32 %v1676_v51  ;;  %v1662_v61 = vmul.f32 0.0078125, %v1644_v49  ;;  %v1677_v52 = vadd.f32 1e-05, %v1661_v19 }
 0x763   :  { %3077 = vrsqrt.f32 %v1675_v30  ;;  %1922 = vmatmul.mubr.bf16.gmra.mrb[56].mxu1 %v1755_v59  ;;  %v1646_v54 = vpop.xlane.xlu0 %1645  ;;  %v2987_v59 = vld [vmem:[#allocation12 + $0x70] sm:$0xff]  }
 0x764   :  { %v1678_v2 = vadd.f32 1e-05, %v1662_v61  ;;  %1931 = vmatprep.mubr.bf16.mxu1 %v3299_v0  ;;  %2879 = vmatpush3.bf16.msra.mxu1 %v3984_v53  ;;  %v1756_v53 = vpack.c.bf16 %v4052_v7, %v4056_v14  ;;  %v1663_v21 = vmul.f32 0.0078125, %v1646_v54 }
 0x765   :  { %v1648_v28 = vpop.xlane.xlu1 %1647  ;;  %2872 = vmatprep.subr.bf16.mxu1 %v3987_v20 }
 0x766   :  { %v3072_v15 = vpop.eup %3071  ;;  %3079 = vrsqrt.f32 %v1678_v2  ;;  %v1664_v11 = vmul.f32 0.0078125, %v1648_v28  ;;  %v1679_v8 = vadd.f32 1e-05, %v1663_v21 }
 0x767   :  { %v1705_v43 = vmul.f32 %v3072_v15, %v3922_v60  ;;  %3081 = vrsqrt.f32 %v1677_v52 }
 0x768   :  { %v3074_v38 = vpop.eup %3073  ;;  %v1680_v42 = vadd.f32 1e-05, %v1664_v11 }
 0x769   :  { %v1706_v44 = vmul.f32 %v3074_v38, %v3925_v22  ;;  %v1725_v34 = vmul.f32 %v3993_v23, %v1705_v43 }
 0x76a   :  { %3083 = vrsqrt.f32 %v1680_v42 }
 0x76b   :  { %v1726_v29 = vmul.f32 %v3993_v23, %v1706_v44  ;;  %1932 = vmatmul.mubr.bf16.gmra.mrb[60].mxu1 %v1756_v53  ;;  %v4070_v12 = vadd.f32 %v4000_v46, %v1725_v34  ;;  %3085 = vrsqrt.f32 %v1679_v8 }
 0x76c   :  { %v3076_v20 = vpop.eup %3075  ;;  %1941 = vmatprep.mubr.bf16.mxu1 %v3299_v0 }
 0x76d   :  { %v3078_v47 = vpop.eup %3077  ;;  %v4066_v60 = vadd.f32 %v4000_v46, %v1726_v29  ;;  %v1708_v22 = vmul.f32 %v3076_v20, %v3935_v17 }
 0x76e   :  { %v1707_v63 = vmul.f32 %v3078_v47, %v3930_v25 }
 0x76f   :  { %v1757_v31 = vpack.c.bf16 %v4066_v60, %v4070_v12  ;;  %v1728_v55 = vmul.f32 %v3993_v23, %v1708_v22 }
 0x770   :  { %v3080_v39 = vpop.eup %3079  ;;  %v1727_v36 = vmul.f32 %v3993_v23, %v1707_v63 }
 0x771   :  { %v3082_v3 = vpop.eup %3081  ;;  %v4079_v17 = vadd.f32 %v4000_v46, %v1728_v55  ;;  %v1710_v26 = vmul.f32 %v3080_v39, %v3945_v62 }
 0x772   :  { %v4083_v25 = vadd.f32 %v4000_v46, %v1727_v36  ;;  %v1709_v32 = vmul.f32 %v3082_v3, %v3940_v10 }
 0x773   :  { %1942 = vmatmul.mubr.bf16.gmra.mrb[64].mxu1 %v1757_v31  ;;  %v1730_v6 = vmul.f32 %v3993_v23, %v1710_v26 }
 0x774   :  { %1951 = vmatprep.mubr.bf16.mxu1 %v3299_v0  ;;  %v1758_v27 = vpack.c.bf16 %v4079_v17, %v4083_v25  ;;  %v3084_v45 = vpop.eup %3083  ;;  %v1729_v50 = vmul.f32 %v3993_v23, %v1709_v32 }
 0x775   :  { %v3086_v24 = vpop.eup %3085  ;;  %v4092_v9 = vadd.f32 %v4000_v46, %v1730_v6  ;;  %v1712_v62 = vmul.f32 %v3084_v45, %v3955_v56 }
 0x776   :  { %v4096_v30 = vadd.f32 %v4000_v46, %v1729_v50  ;;  %v1711_v10 = vmul.f32 %v3086_v24, %v3950_v18  ;;  %v2986_v18 = vld [vmem:[#allocation12 + $0x28] sm:$0xff]  }
 0x777   :  { %v1732_v13 = vmul.f32 %v3993_v23, %v1712_v62  ;;  %2686 = vmatpush3.bf16.msra.mxu0 %v2986_v18  ;;  %2880 = vmatpush3.bf16.msra.mxu1 %v2986_v18 }
 0x778   :  { %v1759_v51 = vpack.c.bf16 %v4092_v9, %v4096_v30  ;;  %v1731_v33 = vmul.f32 %v3993_v23, %v1711_v10  ;;  %2687 = vmatprep.subr.bf16.mxu0 %v2987_v59  ;;  %2873 = vmatprep.subr.bf16.mxu1 %v2987_v59  ;;  %v2990_v23 = vld [vmem:[#allocation12 + $0x38] sm:$0xff]  }
 0x779   :  { %v4105_v49 = vadd.f32 %v4000_v46, %v1732_v13 }
 0x77a   :  { %v4108_v56 = vadd.f32 %v4000_v46, %v1731_v33  ;;  %v1777_v46 = vld [vmem:[%s4398_s7] sm:$0x3] }
 0x77b   :  { %1952 = vmatmul.mubr.bf16.gmra.mrb[68].mxu1 %v1758_v27  ;;  %2688 = vmatpush3.bf16.msra.mxu0 %v2988_v1  ;;  %v4116_v19 = vrot.slane %v1777_v46, %v3449_v41  ;;  %v4119_v16 = vrot.slane %v1777_v46, %v3546_v37 }
 0x77c   :  { %1961 = vmatprep.mubr.bf16.mxu1 %v3299_v0  ;;  %v1760_v61 = vpack.c.bf16 %v4105_v49, %v4108_v56  ;;  %2881 = vmatpush3.bf16.msra.mxu1 %v2988_v1 }
 0x783   :  { %1962 = vmatmul.mubr.bf16.gmra.mrb[72].mxu1 %v1759_v51 }
 0x784   :  { %1971 = vmatprep.mubr.bf16.mxu1 %v3299_v0  ;;  %v2989_v0 = vld [vmem:[#allocation12 + $0x78] sm:$0xff]  }
 0x785   :  { %2689 = vmatprep.subr.bf16.mxu0 %v2989_v0  ;;  %2874 = vmatprep.subr.bf16.mxu1 %v2989_v0 }
 0x786   :  { %2690 = vmatpush3.bf16.msra.mxu0 %v2990_v23  ;;  %2882 = vmatpush3.bf16.msra.mxu1 %v2990_v23 }
 0x78b   :  { %1972 = vmatmul.mubr.bf16.gmra.mrb[76].mxu1 %v1760_v61 }
 0x826   :  { %v1903_v2 = vpop.f32.mrb[48].mxu1 }
 0x827   :  { %v1904_v15 = vadd.f32 %v1903_v2, %v4116_v19  ;;  %v1905_v28 = vpop.f32.mrb[49].mxu1 }
 0x828   :  { %v1906_v52 = vadd.f32 %v1905_v28, %v4119_v16  ;;  %v1907_v38 = vpop.f32.mrb[50].mxu1 }
 0x829   :  { %v1908_v54 = vadd.f32 %v1907_v38, %v4116_v19  ;;  %v1909_v43 = vpop.f32.mrb[51].mxu1  ;;  %v1982_v44 = vmax.f32 %v1904_v15, 0.0 }
 0x82a   :  { %v1910_v11 = vadd.f32 %v1909_v43, %v4119_v16  ;;  %v1983_v21 = vmax.f32 %v1906_v52, 0.0 }
 0x82b   :  { %v1984_v53 = vmax.f32 %v1908_v54, 0.0 }
 0x82c   :  { %v1985_v29 = vmax.f32 %v1910_v11, 0.0 }
 0x82d   :  { %v2014_v20 = vpack.c.bf16 %v1984_v53, %v1982_v44 }
 0x82e   :  { %v2015_v34 = vpack.c.bf16 %v1985_v29, %v1983_v21  ;;  %v1913_v47 = vpop.f32.mrb[52].mxu1 }
 0x82f   :  { %v1914_v42 = vadd.f32 %v1913_v47, %v4116_v19  ;;  %v1915_v22 = vpop.f32.mrb[53].mxu1 }
 0x830   :  { %v1916_v8 = vadd.f32 %v1915_v22, %v4119_v16  ;;  %v1917_v63 = vpop.f32.mrb[54].mxu1  ;;  %2194 = vmatprep.mubr.bf16.mxu0 %v2015_v34 }
 0x831   :  { %v1918_v31 = vadd.f32 %v1917_v63, %v4116_v19  ;;  %v1919_v55 = vpop.f32.mrb[55].mxu1  ;;  %2195 = vmatmul.mubr.bf16.vlgmr.msra.gmra.mrb[64].mxu0 %v2014_v20  ;;  %v1986_v36 = vmax.f32 %v1914_v42, 0.0 }
 0x832   :  { %v1920_v39 = vadd.f32 %v1919_v55, %v4119_v16  ;;  %v1987_v26 = vmax.f32 %v1916_v8, 0.0 }
 0x833   :  { %v1988_v3 = vmax.f32 %v1918_v31, 0.0 }
 0x834   :  { %v1989_v32 = vmax.f32 %v1920_v39, 0.0 }
 0x835   :  { %v2016_v27 = vpack.c.bf16 %v1988_v3, %v1986_v36 }
 0x836   :  { %v2017_v6 = vpack.c.bf16 %v1989_v32, %v1987_v26  ;;  %v1923_v45 = vpop.f32.mrb[56].mxu1 }
 0x837   :  { %v1924_v50 = vadd.f32 %v1923_v45, %v4116_v19  ;;  %v1925_v24 = vpop.f32.mrb[57].mxu1 }
 0x838   :  { %v1926_v62 = vadd.f32 %v1925_v24, %v4119_v16  ;;  %v1927_v10 = vpop.f32.mrb[58].mxu1  ;;  %2202 = vmatprep.mubr.bf16.mxu0 %v2017_v6 }
 0x839   :  { %v1928_v51 = vadd.f32 %v1927_v10, %v4116_v19  ;;  %v1929_v13 = vpop.f32.mrb[59].mxu1  ;;  %2203 = vmatmul.mubr.bf16.gmra.mrb[68].mxu0 %v2016_v27  ;;  %v1990_v61 = vmax.f32 %v1924_v50, 0.0 }
 0x83a   :  { %v1930_v33 = vadd.f32 %v1929_v13, %v4119_v16  ;;  %v1991_v59 = vmax.f32 %v1926_v62, 0.0 }
 0x83b   :  { %v1992_v18 = vmax.f32 %v1928_v51, 0.0 }
 0x83c   :  { %v1993_v1 = vmax.f32 %v1930_v33, 0.0 }
 0x83d   :  { %v2018_v0 = vpack.c.bf16 %v1992_v18, %v1990_v61 }
 0x83e   :  { %v2019_v23 = vpack.c.bf16 %v1993_v1, %v1991_v59  ;;  %v1933_v46 = vpop.f32.mrb[60].mxu1 }
 0x83f   :  { %v1934_v2 = vadd.f32 %v1933_v46, %v4116_v19  ;;  %v1935_v15 = vpop.f32.mrb[61].mxu1 }
 0x840   :  { %v1936_v28 = vadd.f32 %v1935_v15, %v4119_v16  ;;  %v1937_v52 = vpop.f32.mrb[62].mxu1  ;;  %2210 = vmatprep.mubr.bf16.mxu0 %v2019_v23 }
 0x841   :  { %v1938_v38 = vadd.f32 %v1937_v52, %v4116_v19  ;;  %v1939_v54 = vpop.f32.mrb[63].mxu1  ;;  %2211 = vmatmul.mubr.bf16.gmra.mrb[72].mxu0 %v2018_v0  ;;  %v1994_v11 = vmax.f32 %v1934_v2, 0.0 }
 0x842   :  { %v1940_v43 = vadd.f32 %v1939_v54, %v4119_v16  ;;  %v1995_v53 = vmax.f32 %v1936_v28, 0.0 }
 0x843   :  { %v1996_v44 = vmax.f32 %v1938_v38, 0.0 }
 0x844   :  { %v1997_v21 = vmax.f32 %v1940_v43, 0.0 }
 0x845   :  { %v2020_v29 = vpack.c.bf16 %v1996_v44, %v1994_v11 }
 0x846   :  { %v2021_v20 = vpack.c.bf16 %v1997_v21, %v1995_v53  ;;  %v1943_v34 = vpop.f32.mrb[64].mxu1 }
 0x847   :  { %v1944_v47 = vadd.f32 %v1943_v34, %v4116_v19  ;;  %v1945_v42 = vpop.f32.mrb[65].mxu1 }
 0x848   :  { %v1946_v22 = vadd.f32 %v1945_v42, %v4119_v16  ;;  %v1947_v8 = vpop.f32.mrb[66].mxu1  ;;  %2218 = vmatprep.mubr.bf16.mxu0 %v2021_v20 }
 0x849   :  { %v1948_v63 = vadd.f32 %v1947_v8, %v4116_v19  ;;  %v1949_v31 = vpop.f32.mrb[67].mxu1  ;;  %2219 = vmatmul.mubr.bf16.gmra.mrb[76].mxu0 %v2020_v29  ;;  %v1998_v39 = vmax.f32 %v1944_v47, 0.0 }
 0x84a   :  { %v1950_v55 = vadd.f32 %v1949_v31, %v4119_v16  ;;  %v1999_v3 = vmax.f32 %v1946_v22, 0.0 }
 0x84b   :  { %v2000_v36 = vmax.f32 %v1948_v63, 0.0 }
 0x84c   :  { %v2001_v26 = vmax.f32 %v1950_v55, 0.0 }
 0x84d   :  { %v2022_v32 = vpack.c.bf16 %v2000_v36, %v1998_v39 }
 0x84e   :  { %v2023_v27 = vpack.c.bf16 %v2001_v26, %v1999_v3  ;;  %v1953_v6 = vpop.f32.mrb[68].mxu1 }
 0x84f   :  { %v1954_v45 = vadd.f32 %v1953_v6, %v4116_v19  ;;  %v1955_v50 = vpop.f32.mrb[69].mxu1 }
 0x850   :  { %v1956_v24 = vadd.f32 %v1955_v50, %v4119_v16  ;;  %v1957_v62 = vpop.f32.mrb[70].mxu1  ;;  %2226 = vmatprep.mubr.bf16.mxu0 %v2023_v27  ;;  %v2064_v27 = vsub.s32 7, %v3446_v40 }
 0x851   :  { %v1958_v10 = vadd.f32 %v1957_v62, %v4116_v19  ;;  %v1959_v51 = vpop.f32.mrb[71].mxu1  ;;  %2227 = vmatmul.mubr.bf16.gmra.mrb[80].mxu0 %v2022_v32  ;;  %v2002_v33 = vmax.f32 %v1954_v45, 0.0  ;;  %v3120_v45 = vld [vmem:[%s4397_s6] sm:$0xff] }
 0x852   :  { %v1960_v13 = vadd.f32 %v1959_v51, %v4119_v16  ;;  %v2003_v18 = vmax.f32 %v1956_v24, 0.0 }
 0x853   :  { %v2004_v61 = vmax.f32 %v1958_v10, 0.0 }
 0x854   :  { %v2005_v59 = vmax.f32 %v1960_v13, 0.0 }
 0x855   :  { %v2024_v1 = vpack.c.bf16 %v2004_v61, %v2002_v33 }
 0x856   :  { %v2025_v0 = vpack.c.bf16 %v2005_v59, %v2003_v18  ;;  %v1963_v23 = vpop.f32.mrb[72].mxu1 }
 0x857   :  { %v1964_v46 = vadd.f32 %v1963_v23, %v4116_v19  ;;  %v1965_v2 = vpop.f32.mrb[73].mxu1 }
 0x858   :  { %v1966_v15 = vadd.f32 %v1965_v2, %v4119_v16  ;;  %v1967_v28 = vpop.f32.mrb[74].mxu1  ;;  %2234 = vmatprep.mubr.bf16.mxu0 %v2025_v0 }
 0x859   :  { %v1968_v52 = vadd.f32 %v1967_v28, %v4116_v19  ;;  %v1969_v38 = vpop.f32.mrb[75].mxu1  ;;  %2235 = vmatmul.mubr.bf16.gmra.mrb[84].mxu0 %v2024_v1  ;;  %v2006_v43 = vmax.f32 %v1964_v46, 0.0 }
 0x85a   :  { %v1970_v54 = vadd.f32 %v1969_v38, %v4119_v16  ;;  %v2007_v44 = vmax.f32 %v1966_v15, 0.0 }
 0x85b   :  { %v2008_v11 = vmax.f32 %v1968_v52, 0.0 }
 0x85c   :  { %v2009_v53 = vmax.f32 %v1970_v54, 0.0 }
 0x85d   :  { %v2026_v21 = vpack.c.bf16 %v2008_v11, %v2006_v43 }
 0x85e   :  { %v2027_v29 = vpack.c.bf16 %v2009_v53, %v2007_v44  ;;  %v1973_v20 = vpop.f32.mrb[76].mxu1 }
 0x85f   :  { %v1974_v34 = vadd.f32 %v1973_v20, %v4116_v19  ;;  %v1975_v47 = vpop.f32.mrb[77].mxu1 }
 0x860   :  { %v1976_v42 = vadd.f32 %v1975_v47, %v4119_v16  ;;  %v1977_v22 = vpop.f32.mrb[78].mxu1  ;;  %2242 = vmatprep.mubr.bf16.mxu1 %v2027_v29 }
 0x861   :  { %v1978_v8 = vadd.f32 %v1977_v22, %v4116_v19  ;;  %v1979_v63 = vpop.f32.mrb[79].mxu1  ;;  %2243 = vmatmul.mubr.bf16.vlgmr.msra.gmra.mrb[80].mxu1 %v2026_v21  ;;  %v2010_v55 = vmax.f32 %v1974_v34, 0.0  ;;  %v4157_v19 = vrot.slane %v3120_v45, %v2064_v27 }
 0x862   :  { %v1980_v31 = vadd.f32 %v1979_v63, %v4119_v16  ;;  %v2011_v36 = vmax.f32 %v1976_v42, 0.0 }
 0x863   :  { %v2012_v39 = vmax.f32 %v1978_v8, 0.0 }
 0x864   :  { %v2013_v3 = vmax.f32 %v1980_v31, 0.0 }
 0x865   :  { %v2028_v26 = vpack.c.bf16 %v2012_v39, %v2010_v55 }
 0x866   :  { %v2029_v32 = vpack.c.bf16 %v2013_v3, %v2011_v36 }
 0x868   :  { %2250 = vmatprep.mubr.bf16.mxu1 %v2029_v32 }
 0x869   :  { %2251 = vmatmul.mubr.bf16.gmra.mrb[84].mxu1 %v2028_v26 }
 0x904   :  { %v2691_v6 = vpop.f32.mrb[64].mxu0 }
 0x905   :  { %v2692_v50 = vpop.f32.mrb[65].mxu0 }
 0x906   :  { %v2693_v24 = vadd.f32 %v2692_v50, %v2691_v6  ;;  %v2694_v16 = vpop.f32.mrb[66].mxu0 }
 0x907   :  { %v2695_v62 = vpop.f32.mrb[67].mxu0 }
 0x908   :  { %v2197_v10 = vadd.f32 %v2693_v24, %v4157_v19  ;;  %v2696_v51 = vadd.f32 %v2695_v62, %v2694_v16 }
 0x90a   :  { %v2200_v13 = vadd.f32 %v2696_v51, %v4157_v19  ;;  %v4162_v33 = vadd.f32 %v2197_v10, %v4004_v48 }
 0x90c   :  { %2275 = vadd.xlane.f32.xlu0 %v4162_v33  ;;  %v2697_v40 = vpop.f32.mrb[68].mxu0  ;;  %v4166_v61 = vadd.f32 %v2200_v13, %v4007_v35 }
 0x90d   :  { %v2698_v18 = vpop.f32.mrb[69].mxu0 }
 0x90e   :  { %v2699_v59 = vadd.f32 %v2698_v18, %v2697_v40  ;;  %2277 = vadd.xlane.f32.xlu1 %v4166_v61  ;;  %v2700_v1 = vpop.f32.mrb[70].mxu0 }
 0x90f   :  { %v2701_v0 = vpop.f32.mrb[71].mxu0 }
 0x910   :  { %v2205_v23 = vadd.f32 %v2699_v59, %v4157_v19  ;;  %v2702_v46 = vadd.f32 %v2701_v0, %v2700_v1 }
 0x912   :  { %v2208_v2 = vadd.f32 %v2702_v46, %v4157_v19  ;;  %v4172_v48 = vadd.f32 %v2205_v23, %v4023_v5 }
 0x914   :  { %2279 = vadd.xlane.f32.xlu0 %v4172_v48  ;;  %v2703_v15 = vpop.f32.mrb[72].mxu0  ;;  %v4176_v35 = vadd.f32 %v2208_v2, %v4018_v4 }
 0x915   :  { %v2704_v28 = vpop.f32.mrb[73].mxu0 }
 0x916   :  { %v2705_v52 = vadd.f32 %v2704_v28, %v2703_v15  ;;  %2281 = vadd.xlane.f32.xlu1 %v4176_v35  ;;  %v2706_v38 = vpop.f32.mrb[74].mxu0 }
 0x917   :  { %v2707_v54 = vpop.f32.mrb[75].mxu0 }
 0x918   :  { %v2213_v43 = vadd.f32 %v2705_v52, %v4157_v19  ;;  %v2708_v11 = vadd.f32 %v2707_v54, %v2706_v38 }
 0x91a   :  { %v2216_v44 = vadd.f32 %v2708_v11, %v4157_v19  ;;  %v4182_v5 = vadd.f32 %v2213_v43, %v4040_v58 }
 0x91c   :  { %2283 = vadd.xlane.f32.xlu0 %v4182_v5  ;;  %v2709_v53 = vpop.f32.mrb[76].mxu0  ;;  %v4186_v4 = vadd.f32 %v2216_v44, %v4035_v57 }
 0x91d   :  { %v2710_v21 = vpop.f32.mrb[77].mxu0 }
 0x91e   :  { %v2711_v29 = vadd.f32 %v2710_v21, %v2709_v53  ;;  %2285 = vadd.xlane.f32.xlu1 %v4186_v4  ;;  %v2712_v20 = vpop.f32.mrb[78].mxu0 }
 0x91f   :  { %v2713_v34 = vpop.f32.mrb[79].mxu0 }
 0x920   :  { %v2221_v47 = vadd.f32 %v2711_v29, %v4157_v19  ;;  %v2714_v42 = vadd.f32 %v2713_v34, %v2712_v20 }
 0x922   :  { %v2224_v22 = vadd.f32 %v2714_v42, %v4157_v19  ;;  %v4192_v58 = vadd.f32 %v2221_v47, %v4056_v14 }
 0x924   :  { %2287 = vadd.xlane.f32.xlu0 %v4192_v58  ;;  %v2715_v8 = vpop.f32.mrb[80].mxu0  ;;  %v4196_v57 = vadd.f32 %v2224_v22, %v4052_v7 }
 0x925   :  { %v2716_v63 = vpop.f32.mrb[81].mxu0 }
 0x926   :  { %v2717_v31 = vadd.f32 %v2716_v63, %v2715_v8  ;;  %2289 = vadd.xlane.f32.xlu1 %v4196_v57  ;;  %v2718_v55 = vpop.f32.mrb[82].mxu0 }
 0x927   :  { %v2719_v39 = vpop.f32.mrb[83].mxu0 }
 0x928   :  { %v2229_v36 = vadd.f32 %v2717_v31, %v4157_v19  ;;  %v2720_v3 = vadd.f32 %v2719_v39, %v2718_v55 }
 0x92a   :  { %v2232_v26 = vadd.f32 %v2720_v3, %v4157_v19  ;;  %v4202_v14 = vadd.f32 %v2229_v36, %v4070_v12 }
 0x92c   :  { %2291 = vadd.xlane.f32.xlu0 %v4202_v14  ;;  %v2721_v32 = vpop.f32.mrb[84].mxu0  ;;  %v4206_v7 = vadd.f32 %v2232_v26, %v4066_v60 }
 0x92d   :  { %v2722_v27 = vpop.f32.mrb[85].mxu0 }
 0x92e   :  { %v2723_v6 = vadd.f32 %v2722_v27, %v2721_v32  ;;  %2293 = vadd.xlane.f32.xlu1 %v4206_v7  ;;  %v2724_v45 = vpop.f32.mrb[86].mxu0 }
 0x92f   :  { %v2725_v50 = vpop.f32.mrb[87].mxu0 }
 0x930   :  { %v2237_v24 = vadd.f32 %v2723_v6, %v4157_v19  ;;  %v2726_v16 = vadd.f32 %v2725_v50, %v2724_v45 }
 0x932   :  { %v2240_v62 = vadd.f32 %v2726_v16, %v4157_v19  ;;  %v4212_v12 = vadd.f32 %v2237_v24, %v4083_v25 }
 0x934   :  { %2295 = vadd.xlane.f32.xlu0 %v4212_v12  ;;  %v2727_v10 = vpop.f32.mrb[80].mxu1  ;;  %v4216_v60 = vadd.f32 %v2240_v62, %v4079_v17 }
 0x935   :  { %v2728_v51 = vpop.f32.mrb[81].mxu1 }
 0x936   :  { %v2729_v13 = vadd.f32 %v2728_v51, %v2727_v10  ;;  %2297 = vadd.xlane.f32.xlu1 %v4216_v60  ;;  %v2730_v40 = vpop.f32.mrb[82].mxu1 }
 0x937   :  { %v2731_v18 = vpop.f32.mrb[83].mxu1 }
 0x938   :  { %v2245_v59 = vadd.f32 %v2729_v13, %v4157_v19  ;;  %v2732_v1 = vadd.f32 %v2731_v18, %v2730_v40 }
 0x93a   :  { %v2248_v0 = vadd.f32 %v2732_v1, %v4157_v19  ;;  %v4222_v25 = vadd.f32 %v2245_v59, %v4096_v30 }
 0x93c   :  { %2299 = vadd.xlane.f32.xlu0 %v4222_v25  ;;  %v2733_v23 = vpop.f32.mrb[84].mxu1  ;;  %v4226_v17 = vadd.f32 %v2248_v0, %v4092_v9 }
 0x93d   :  { %v2734_v46 = vpop.f32.mrb[85].mxu1 }
 0x93e   :  { %v2735_v2 = vadd.f32 %v2734_v46, %v2733_v23  ;;  %2301 = vadd.xlane.f32.xlu1 %v4226_v17  ;;  %v2736_v15 = vpop.f32.mrb[86].mxu1 }
 0x93f   :  { %v2737_v28 = vpop.f32.mrb[87].mxu1 }
 0x940   :  { %v2253_v52 = vadd.f32 %v2735_v2, %v4157_v19  ;;  %v2738_v38 = vadd.f32 %v2737_v28, %v2736_v15 }
 0x942   :  { %v2256_v54 = vadd.f32 %v2738_v38, %v4157_v19  ;;  %v4232_v30 = vadd.f32 %v2253_v52, %v4108_v56 }
 0x944   :  { %2303 = vadd.xlane.f32.xlu0 %v4232_v30  ;;  %v4236_v43 = vadd.f32 %v2256_v54, %v4105_v49 }
 0x946   :  { %2305 = vadd.xlane.f32.xlu1 %v4236_v43 }
 0x999   :  { %v2276_v9 = vpop.xlane.xlu0 %2275 }
 0x99a   :  { %v2307_v11 = vmul.f32 0.0078125, %v2276_v9 }
 0x99b   :  { %v2278_v44 = vpop.xlane.xlu1 %2277 }
 0x99c   :  { %v4240_v53 = vsub.f32 %v4162_v33, %v2307_v11  ;;  %v2308_v21 = vmul.f32 0.0078125, %v2278_v44 }
 0x99e   :  { %v4243_v29 = vsub.f32 %v4166_v61, %v2308_v21  ;;  %v2339_v56 = vmul.f32 %v4240_v53, %v4240_v53 }
 0x9a0   :  { %2355 = vadd.xlane.f32.xlu0 %v2339_v56  ;;  %v2340_v49 = vmul.f32 %v4243_v29, %v4243_v29 }
 0x9a1   :  { %v2280_v19 = vpop.xlane.xlu0 %2279 }
 0x9a2   :  { %v2309_v20 = vmul.f32 0.0078125, %v2280_v19  ;;  %2357 = vadd.xlane.f32.xlu1 %v2340_v49 }
 0x9a3   :  { %v2282_v34 = vpop.xlane.xlu1 %2281 }
 0x9a4   :  { %v4250_v47 = vsub.f32 %v4172_v48, %v2309_v20  ;;  %v2310_v33 = vmul.f32 0.0078125, %v2282_v34 }
 0x9a6   :  { %v4253_v42 = vsub.f32 %v4176_v35, %v2310_v33  ;;  %v2341_v61 = vmul.f32 %v4250_v47, %v4250_v47 }
 0x9a8   :  { %2359 = vadd.xlane.f32.xlu0 %v2341_v61  ;;  %v2342_v22 = vmul.f32 %v4253_v42, %v4253_v42 }
 0x9a9   :  { %v2284_v8 = vpop.xlane.xlu0 %2283 }
 0x9aa   :  { %v2311_v63 = vmul.f32 0.0078125, %v2284_v8  ;;  %2361 = vadd.xlane.f32.xlu1 %v2342_v22  ;;  %v114_v22 = vld [vmem:[%s4397_s6 + $0x8] sm:$0x3]  ;;  %s3300_s6 = smov [#allocation14]  }
 0x9ab   :  { %v2286_v31 = vpop.xlane.xlu1 %2285  ;;  %s2512_s23 = sshll.u32 %s3300_s6, 4  ;;  %s2513_s23 = int_to_ptr.vmem [resolvable:$true] %s2512_s23 }
 0x9ac   :  { %v4260_v55 = vsub.f32 %v4182_v5, %v2311_v63  ;;  %v2312_v48 = vmul.f32 0.0078125, %v2286_v31  ;;  %s3253_s25 = scalar_lea.vmem %s2513_s23, 2048  ;;  %p3258_p7 = scmp.lt.s32.totalorder %s2513_s23, %s2513_s23 }
 0x9ad   :  { %p3254_p6 = scmp.ne.s32.totalorder %s2513_s23, %s3253_s25  ;;  %p3259_p8 = scmp.lt.s32.totalorder %s3253_s25, %s3253_s25 }
 0x9ae   :  { %v4263_v39 = vsub.f32 %v4186_v4, %v2312_v48  ;;  %v2343_v35 = vmul.f32 %v4260_v55, %v4260_v55  ;;  %v4323_v48 = vrot.slane %v114_v22, %v3449_v41 }
 0x9af   :  { %p3260_p9 = por %p3259_p8, %p3258_p7 }
 0x9b0   :  { %2363 = vadd.xlane.f32.xlu0 %v2343_v35  ;;  %v2344_v36 = vmul.f32 %v4263_v39, %v4263_v39 }
 0x9b1   :  { %v2288_v3 = vpop.xlane.xlu0 %2287  ;;  %p3261_p10 = pnand %p3260_p9, %p3254_p6 }
 0x9b2   :  { %v2313_v26 = vmul.f32 0.0078125, %v2288_v3  ;;  %2365 = vadd.xlane.f32.xlu1 %v2344_v36  ;;  %v4326_v36 = vrot.slane %v114_v22, %v3546_v37 }
 0x9b3   :  { %v2290_v32 = vpop.xlane.xlu1 %2289 }
 0x9b4   :  { %v4270_v27 = vsub.f32 %v4192_v58, %v2313_v26  ;;  %v2314_v5 = vmul.f32 0.0078125, %v2290_v32 }
 0x9b6   :  { %v4273_v6 = vsub.f32 %v4196_v57, %v2314_v5  ;;  %v2345_v4 = vmul.f32 %v4270_v27, %v4270_v27 }
 0x9b8   :  { %2367 = vadd.xlane.f32.xlu0 %v2345_v4  ;;  %v2346_v45 = vmul.f32 %v4273_v6, %v4273_v6 }
 0x9b9   :  { %v2292_v50 = vpop.xlane.xlu0 %2291 }
 0x9ba   :  { %v2315_v24 = vmul.f32 0.0078125, %v2292_v50  ;;  %2369 = vadd.xlane.f32.xlu1 %v2346_v45 }
 0x9bb   :  { %v2294_v16 = vpop.xlane.xlu1 %2293 }
 0x9bc   :  { %v4280_v62 = vsub.f32 %v4202_v14, %v2315_v24  ;;  %v2316_v58 = vmul.f32 0.0078125, %v2294_v16 }
 0x9be   :  { %v4283_v10 = vsub.f32 %v4206_v7, %v2316_v58  ;;  %v2347_v57 = vmul.f32 %v4280_v62, %v4280_v62 }
 0x9c0   :  { %2371 = vadd.xlane.f32.xlu0 %v2347_v57  ;;  %v2348_v51 = vmul.f32 %v4283_v10, %v4283_v10 }
 0x9c1   :  { %v2296_v13 = vpop.xlane.xlu0 %2295 }
 0x9c2   :  { %v2317_v40 = vmul.f32 0.0078125, %v2296_v13  ;;  %2373 = vadd.xlane.f32.xlu1 %v2348_v51 }
 0x9c3   :  { %v2298_v18 = vpop.xlane.xlu1 %2297 }
 0x9c4   :  { %v4290_v59 = vsub.f32 %v4212_v12, %v2317_v40  ;;  %v2318_v14 = vmul.f32 0.0078125, %v2298_v18 }
 0x9c6   :  { %v4293_v1 = vsub.f32 %v4216_v60, %v2318_v14  ;;  %v2349_v7 = vmul.f32 %v4290_v59, %v4290_v59 }
 0x9c8   :  { %2375 = vadd.xlane.f32.xlu0 %v2349_v7  ;;  %v2350_v0 = vmul.f32 %v4293_v1, %v4293_v1 }
 0x9c9   :  { %v2300_v23 = vpop.xlane.xlu0 %2299 }
 0x9ca   :  { %v2319_v46 = vmul.f32 0.0078125, %v2300_v23  ;;  %2377 = vadd.xlane.f32.xlu1 %v2350_v0 }
 0x9cb   :  { %v2302_v2 = vpop.xlane.xlu1 %2301 }
 0x9cc   :  { %v4300_v15 = vsub.f32 %v4222_v25, %v2319_v46  ;;  %v2320_v12 = vmul.f32 0.0078125, %v2302_v2 }
 0x9ce   :  { %v4303_v28 = vsub.f32 %v4226_v17, %v2320_v12  ;;  %v2351_v60 = vmul.f32 %v4300_v15, %v4300_v15 }
 0x9d0   :  { %2379 = vadd.xlane.f32.xlu0 %v2351_v60  ;;  %v2352_v52 = vmul.f32 %v4303_v28, %v4303_v28 }
 0x9d1   :  { %v2304_v38 = vpop.xlane.xlu0 %2303 }
 0x9d2   :  { %v2321_v54 = vmul.f32 0.0078125, %v2304_v38  ;;  %2381 = vadd.xlane.f32.xlu1 %v2352_v52 }
 0x9d3   :  { %v2306_v9 = vpop.xlane.xlu1 %2305 }
 0x9d4   :  { %v4310_v11 = vsub.f32 %v4232_v30, %v2321_v54  ;;  %v2322_v25 = vmul.f32 0.0078125, %v2306_v9 }
 0x9d6   :  { %v4313_v44 = vsub.f32 %v4236_v43, %v2322_v25  ;;  %v2353_v17 = vmul.f32 %v4310_v11, %v4310_v11 }
 0x9d8   :  { %2383 = vadd.xlane.f32.xlu0 %v2353_v17  ;;  %v2354_v21 = vmul.f32 %v4313_v44, %v4313_v44 }
 0x9da   :  { %2385 = vadd.xlane.f32.xlu1 %v2354_v21 }
 0xa2d   :  { %v2356_v56 = vpop.xlane.xlu0 %2355 }
 0xa2e   :  { %v2387_v49 = vmul.f32 0.0078125, %v2356_v56 }
 0xa2f   :  { %v2358_v19 = vpop.xlane.xlu1 %2357 }
 0xa30   :  { %v2403_v20 = vadd.f32 1e-05, %v2387_v49  ;;  %v2388_v34 = vmul.f32 0.0078125, %v2358_v19 }
 0xa32   :  { %3087 = vrsqrt.f32 %v2403_v20  ;;  %v2404_v30 = vadd.f32 1e-05, %v2388_v34 }
 0xa34   :  { %3089 = vrsqrt.f32 %v2404_v30 }
 0xa35   :  { %v2360_v33 = vpop.xlane.xlu0 %2359 }
 0xa36   :  { %v2389_v61 = vmul.f32 0.0078125, %v2360_v33 }
 0xa37   :  { %v2362_v43 = vpop.xlane.xlu1 %2361 }
 0xa38   :  { %v2405_v8 = vadd.f32 1e-05, %v2389_v61  ;;  %v2390_v63 = vmul.f32 0.0078125, %v2362_v43 }
 0xa3a   :  { %3091 = vrsqrt.f32 %v2405_v8  ;;  %v2406_v31 = vadd.f32 1e-05, %v2390_v63 }
 0xa3c   :  { %v3088_v35 = vpop.eup %3087  ;;  %3093 = vrsqrt.f32 %v2406_v31 }
 0xa3d   :  { %v2435_v3 = vmul.f32 %v3088_v35, %v4240_v53  ;;  %v2364_v26 = vpop.xlane.xlu0 %2363 }
 0xa3e   :  { %v3090_v32 = vpop.eup %3089  ;;  %v2391_v5 = vmul.f32 0.0078125, %v2364_v26 }
 0xa3f   :  { %v2455_v4 = vmul.f32 %v4323_v48, %v2435_v3  ;;  %v2436_v45 = vmul.f32 %v3090_v32, %v4243_v29  ;;  %v2366_v50 = vpop.xlane.xlu1 %2365 }
 0xa40   :  { %v2407_v24 = vadd.f32 1e-05, %v2391_v5  ;;  %v2392_v16 = vmul.f32 0.0078125, %v2366_v50 }
 0xa41   :  { %v2475_v41 = vadd.f32 %v4326_v36, %v2455_v4  ;;  %v2456_v58 = vmul.f32 %v4323_v48, %v2436_v45 }
 0xa42   :  { %3095 = vrsqrt.f32 %v2407_v24  ;;  %v2408_v57 = vadd.f32 1e-05, %v2392_v16 }
 0xa43   :  { %2491 = vst [vmem:[#allocation14] sm:$0xff] %v2475_v41  ;;  %v2476_v37 = vadd.f32 %v4326_v36, %v2456_v58 }
 0xa44   :  { %v3092_v53 = vpop.eup %3091  ;;  %3097 = vrsqrt.f32 %v2408_v57 }
 0xa45   :  { %2492 = vst [vmem:[#allocation14 + $0x8] sm:$0xff] %v2476_v37  ;;  %v2437_v51 = vmul.f32 %v3092_v53, %v4250_v47  ;;  %v2368_v13 = vpop.xlane.xlu0 %2367 }
 0xa46   :  { %v3094_v40 = vpop.eup %3093  ;;  %v2393_v29 = vmul.f32 0.0078125, %v2368_v13 }
 0xa47   :  { %v2457_v18 = vmul.f32 %v4323_v48, %v2437_v51  ;;  %v2438_v14 = vmul.f32 %v3094_v40, %v4253_v42  ;;  %v2370_v7 = vpop.xlane.xlu1 %2369 }
 0xa48   :  { %v2409_v0 = vadd.f32 1e-05, %v2393_v29  ;;  %v2394_v23 = vmul.f32 0.0078125, %v2370_v7 }
 0xa49   :  { %v2477_v46 = vadd.f32 %v4326_v36, %v2457_v18  ;;  %v2458_v2 = vmul.f32 %v4323_v48, %v2438_v14 }
 0xa4a   :  { %3099 = vrsqrt.f32 %v2409_v0  ;;  %v2410_v12 = vadd.f32 1e-05, %v2394_v23 }
 0xa4b   :  { %2493 = vst [vmem:[#allocation14 + $0x10] sm:$0xff] %v2477_v46  ;;  %v2478_v60 = vadd.f32 %v4326_v36, %v2458_v2 }
 0xa4c   :  { %v3096_v47 = vpop.eup %3095  ;;  %3101 = vrsqrt.f32 %v2410_v12 }
 0xa4d   :  { %2494 = vst [vmem:[#allocation14 + $0x18] sm:$0xff] %v2478_v60  ;;  %v2439_v52 = vmul.f32 %v3096_v47, %v4260_v55  ;;  %v2372_v38 = vpop.xlane.xlu0 %2371 }
 0xa4e   :  { %v3098_v54 = vpop.eup %3097  ;;  %v2395_v42 = vmul.f32 0.0078125, %v2372_v38 }
 0xa4f   :  { %v2459_v9 = vmul.f32 %v4323_v48, %v2439_v52  ;;  %v2440_v25 = vmul.f32 %v3098_v54, %v4263_v39  ;;  %v2374_v17 = vpop.xlane.xlu1 %2373 }
 0xa50   :  { %v2411_v21 = vadd.f32 1e-05, %v2395_v42  ;;  %v2396_v56 = vmul.f32 0.0078125, %v2374_v17 }
 0xa51   :  { %v2479_v49 = vadd.f32 %v4326_v36, %v2459_v9  ;;  %v2460_v19 = vmul.f32 %v4323_v48, %v2440_v25 }
 0xa52   :  { %3103 = vrsqrt.f32 %v2411_v21  ;;  %v2412_v20 = vadd.f32 1e-05, %v2396_v56 }
 0xa53   :  { %2495 = vst [vmem:[#allocation14 + $0x20] sm:$0xff] %v2479_v49  ;;  %v2480_v34 = vadd.f32 %v4326_v36, %v2460_v19 }
 0xa54   :  { %v3100_v55 = vpop.eup %3099  ;;  %3105 = vrsqrt.f32 %v2412_v20 }
 0xa55   :  { %2496 = vst [vmem:[#allocation14 + $0x28] sm:$0xff] %v2480_v34  ;;  %v2441_v30 = vmul.f32 %v3100_v55, %v4270_v27  ;;  %v2376_v33 = vpop.xlane.xlu0 %2375 }
 0xa56   :  { %v3102_v61 = vpop.eup %3101  ;;  %v2397_v39 = vmul.f32 0.0078125, %v2376_v33 }
 0xa57   :  { %v2461_v43 = vmul.f32 %v4323_v48, %v2441_v30  ;;  %v2442_v22 = vmul.f32 %v3102_v61, %v4273_v6  ;;  %v2378_v8 = vpop.xlane.xlu1 %2377 }
 0xa58   :  { %v2413_v63 = vadd.f32 1e-05, %v2397_v39  ;;  %v2398_v31 = vmul.f32 0.0078125, %v2378_v8 }
 0xa59   :  { %v2481_v35 = vadd.f32 %v4326_v36, %v2461_v43  ;;  %v2462_v3 = vmul.f32 %v4323_v48, %v2442_v22 }
 0xa5a   :  { %3107 = vrsqrt.f32 %v2413_v63  ;;  %v2414_v26 = vadd.f32 1e-05, %v2398_v31 }
 0xa5b   :  { %2497 = vst [vmem:[#allocation14 + $0x30] sm:$0xff] %v2481_v35  ;;  %v2482_v32 = vadd.f32 %v4326_v36, %v2462_v3 }
 0xa5c   :  { %v3104_v27 = vpop.eup %3103  ;;  %3109 = vrsqrt.f32 %v2414_v26 }
 0xa5d   :  { %2498 = vst [vmem:[#allocation14 + $0x38] sm:$0xff] %v2482_v32  ;;  %v2443_v5 = vmul.f32 %v3104_v27, %v4280_v62  ;;  %v2380_v4 = vpop.xlane.xlu0 %2379 }
 0xa5e   :  { %v3106_v45 = vpop.eup %3105  ;;  %v2399_v6 = vmul.f32 0.0078125, %v2380_v4 }
 0xa5f   :  { %v2463_v50 = vmul.f32 %v4323_v48, %v2443_v5  ;;  %v2444_v24 = vmul.f32 %v3106_v45, %v4283_v10  ;;  %v2382_v16 = vpop.xlane.xlu1 %2381 }
 0xa60   :  { %v2415_v41 = vadd.f32 1e-05, %v2399_v6  ;;  %v2400_v58 = vmul.f32 0.0078125, %v2382_v16 }
 0xa61   :  { %v2483_v57 = vadd.f32 %v4326_v36, %v2463_v50  ;;  %v2464_v37 = vmul.f32 %v4323_v48, %v2444_v24 }
 0xa62   :  { %3111 = vrsqrt.f32 %v2415_v41  ;;  %v2416_v53 = vadd.f32 1e-05, %v2400_v58 }
 0xa63   :  { %2499 = vst [vmem:[#allocation14 + $0x40] sm:$0xff] %v2483_v57  ;;  %v2484_v51 = vadd.f32 %v4326_v36, %v2464_v37 }
 0xa64   :  { %v3108_v62 = vpop.eup %3107  ;;  %3113 = vrsqrt.f32 %v2416_v53 }
 0xa65   :  { %2500 = vst [vmem:[#allocation14 + $0x48] sm:$0xff] %v2484_v51  ;;  %v2445_v13 = vmul.f32 %v3108_v62, %v4290_v59  ;;  %v2384_v40 = vpop.xlane.xlu0 %2383 }
 0xa66   :  { %v3110_v29 = vpop.eup %3109  ;;  %v2401_v10 = vmul.f32 0.0078125, %v2384_v40 }
 0xa67   :  { %v2465_v18 = vmul.f32 %v4323_v48, %v2445_v13  ;;  %v2446_v14 = vmul.f32 %v3110_v29, %v4293_v1  ;;  %v2386_v7 = vpop.xlane.xlu1 %2385 }
 0xa68   :  { %v2417_v0 = vadd.f32 1e-05, %v2401_v10  ;;  %v2402_v23 = vmul.f32 0.0078125, %v2386_v7 }
 0xa69   :  { %v2485_v46 = vadd.f32 %v4326_v36, %v2465_v18  ;;  %v2466_v2 = vmul.f32 %v4323_v48, %v2446_v14 }
 0xa6a   :  { %3115 = vrsqrt.f32 %v2417_v0  ;;  %v2418_v12 = vadd.f32 1e-05, %v2402_v23 }
 0xa6b   :  { %2501 = vst [vmem:[#allocation14 + $0x50] sm:$0xff] %v2485_v46  ;;  %v2486_v60 = vadd.f32 %v4326_v36, %v2466_v2 }
 0xa6c   :  { %v3112_v59 = vpop.eup %3111  ;;  %3117 = vrsqrt.f32 %v2418_v12 }
 0xa6d   :  { %2502 = vst [vmem:[#allocation14 + $0x58] sm:$0xff] %v2486_v60  ;;  %v2447_v47 = vmul.f32 %v3112_v59, %v4300_v15 }
 0xa6e   :  { %v3114_v52 = vpop.eup %3113 }
 0xa6f   :  { %v2467_v1 = vmul.f32 %v4323_v48, %v2447_v47  ;;  %v2448_v38 = vmul.f32 %v3114_v52, %v4303_v28 }
 0xa71   :  { %v2487_v54 = vadd.f32 %v4326_v36, %v2467_v1  ;;  %v2468_v42 = vmul.f32 %v4323_v48, %v2448_v38 }
 0xa73   :  { %2503 = vst [vmem:[#allocation14 + $0x60] sm:$0xff] %v2487_v54  ;;  %v2488_v9 = vadd.f32 %v4326_v36, %v2468_v42 }
 0xa74   :  { %v3116_v25 = vpop.eup %3115 }
 0xa75   :  { %2504 = vst [vmem:[#allocation14 + $0x68] sm:$0xff] %v2488_v9  ;;  %v2449_v17 = vmul.f32 %v3116_v25, %v4310_v11 }
 0xa76   :  { %v3118_v21 = vpop.eup %3117 }
 0xa77   :  { %v2469_v56 = vmul.f32 %v4323_v48, %v2449_v17  ;;  %v2450_v15 = vmul.f32 %v3118_v21, %v4313_v44 }
 0xa79   :  { %v2489_v28 = vadd.f32 %v4326_v36, %v2469_v56  ;;  %v2470_v49 = vmul.f32 %v4323_v48, %v2450_v15 }
 0xa7b   :  { %2505 = vst [vmem:[#allocation14 + $0x70] sm:$0xff] %v2489_v28  ;;  %v2490_v19 = vadd.f32 %v4326_v36, %v2470_v49 }
 0xa7d   :  { %2506 = vst [vmem:[#allocation14 + $0x78] sm:$0xff] %v2490_v19 }
 0xa7e   :  { %3264 = shalt.err (!%p3261_p10)
}
 0xa7f   :  { %s3265_s2 = scalar_lea.hbm %s4399_s8, 2048 }
 0xa80   :  { %p3266_p11 = scmp.ne.s32.totalorder %s4399_s8, %s3265_s2  ;;  %p3269_p12 = scmp.lt.u32.totalorder %s3265_s2, %s4399_s8 }
 0xa82   :  { %p3271_p13 = pnand %p3269_p12, %p3266_p11 }
 0xa84   :  { %3274 = shalt.err (!%p3271_p13)
}
 0xa85   :  { %2518 = dma.vmem_to_hbm [thread:$0]  %s2513_s23, 2048, %s4399_s8, [#allocation5], %s3292_s3, %s3292_s3, %s3293_s20  }
 0xa86   :  { %3283 = dma.done.wait [#allocation5], 2048  }
 0xa87   :  { %3284 = vsyncadd [#allocation5], 4294965248 }
 0xa88   :  { %2522 = vsyncpa [#allocation4], 1 }
 0xa89   :  { %2523 = vsyncpa [#allocation7], 1 }
 0xa8a   :  { %2524 = vsyncpa [#allocation10], 1 }
 0xa8b   :  { %2525 = vsyncpa [#allocation13], 1 }
 0xa8c   :  { %2526 = vsyncpa [#allocation5], 1 }

</bundles_post_ra>
